<compile_context>
chip_gen: v7x
topology: tpu7x:2x2x1
jax: 0.10.0
libtpu: 0.0.40
codegen_flags: <defaults>
</compile_context>

<pallas_src>
import functools

import numpy as np
import jax
import jax.numpy as jnp
from jax.experimental import pallas as pl
from jax.experimental.pallas import tpu as pltpu


LOSSES = ("class", "nodes", "edges", "conns")
WEIGHT_DICT = {"boxes": 2.0, "class": 3.0, "cards": 1.0, "nodes": 5.0,
               "edges": 4.0, "conns": 2.0}

_LANE = 128          # TPU lane width; ragged sample axes are padded to this bucket
_OUT_LANES = 128     # lane-dense scalar output row


def _pad_len(n):
    return max(_LANE, ((int(n) + _LANE - 1) // _LANE) * _LANE)


# ----------------------------------------------------------------------------- #
# Fused Pallas kernel
# ----------------------------------------------------------------------------- #
def _sum_all(x):
    """Reduce a 2-D tile to a (1, 1) tile (lane reduce then sublane reduce)."""
    return jnp.sum(jnp.sum(x, axis=1, keepdims=True), axis=0, keepdims=True)


def _binary_nll(z, label_f):
    """2-class softmax CE from the logit difference z = l1 - l0 (stable softplus)."""
    return jnp.maximum(z, 0.0) - z * label_f + jnp.log(1.0 + jnp.exp(-jnp.abs(z)))


def _weighted_mean(nll, w):
    """sum(w * nll) / sum(w), guarded so all-padding rows give 0 (not NaN)."""
    num = _sum_all(w * nll)
    den = _sum_all(w)
    den = jnp.where(den > 0.0, den, 1.0)
    return num * pl.reciprocal(den, approx=True)


def _gather_cols(src_t, idx_row):
    """Gather columns of src_t ([D, K]) at idx_row ([1, M]) via one-hot matmul."""
    k = src_t.shape[-1]
    sel = (jax.lax.broadcasted_iota(jnp.int32, (k, idx_row.shape[-1]), 0)
           == idx_row).astype(jnp.float32)
    return jnp.dot(src_t, sel, preferred_element_type=jnp.float32)


def _mlp_ce(parts, w1, b1, w2, b2, w3, b3, label_f, valid, pos_w):
    """3-layer ReLU MLP (feature-major, M on lanes) fused with weighted 2-class CE."""
    x = jnp.concatenate(parts, axis=0)                                     # [F, M]
    h1 = jnp.maximum(jnp.dot(w1, x, preferred_element_type=jnp.float32) + b1, 0.0)
    h2 = jnp.maximum(jnp.dot(w2, h1, preferred_element_type=jnp.float32) + b2, 0.0)
    lo = jnp.dot(w3, h2, preferred_element_type=jnp.float32) + b3          # [2, M]
    z = lo[1:2, :] - lo[0:1, :]                                            # [1, M]
    nll = _binary_nll(z, label_f)
    w = jnp.where(label_f > 0.5, pos_w, 1.0) * valid
    return _weighted_mean(nll, w)


def _fused_loss_kernel(cls_logits_ref, cls_label_ref,
                       pred2_ref, node_tgt_ref, node_idx_ref,
                       obj_ref, rel_ref, e_ref, c_ref,
                       rw1_ref, rb1_ref, rw2_ref, rb2_ref, rw3_ref, rb3_ref,
                       cw1_ref, cb1_ref, cw2_ref, cb2_ref, cw3_ref, cb3_ref,
                       out_ref):
    f32 = jnp.float32

    # ---- class loss: weighted 2-class CE over every query (weights [0.2, 0.8]) ----
    lg = cls_logits_ref[...]                                 # [2, Mc]
    zc = lg[1:2, :] - lg[0:1, :]
    clab_i = cls_label_ref[...]                              # [1, Mc], -1 = lane pad
    cvalid = (clab_i >= 0).astype(f32)
    clab = jnp.maximum(clab_i, 0).astype(f32)
    w_cls = jnp.where(clab > 0.5, 0.8, 0.2) * cvalid
    loss_class = _weighted_mean(_binary_nll(zc, clab), w_cls)

    # ---- node loss: L1 over matched (pred, target) pairs, / num_nodes ----
    nidx_i = node_idx_ref[...]                               # [1, Mn], -1 = pad
    nvalid = (nidx_i >= 0).astype(f32)
    pred_g = _gather_cols(pred2_ref[...], jnp.maximum(nidx_i, 0))   # [2, Mn]
    diff = jnp.abs(pred_g - node_tgt_ref[...]) * nvalid
    num_nodes = _sum_all(nvalid)
    num_nodes = jnp.where(num_nodes > 0.0, num_nodes, 1.0)
    loss_nodes = _sum_all(diff) * pl.reciprocal(num_nodes, approx=True)

    # ---- edge loss: gather endpoints + relation token, 3-layer MLP, weighted CE ----
    obj_t = obj_ref[...]                                     # [H, B*obj_token]
    rel_t = rel_ref[...]                                     # [H, B]
    e = e_ref[...]                                           # [4, Me] int32
    e0, e1, eb, elab_i = e[0:1, :], e[1:2, :], e[2:3, :], e[3:4, :]
    evalid = (e0 >= 0).astype(f32)
    a0 = _gather_cols(obj_t, jnp.maximum(e0, 0))
    a1 = _gather_cols(obj_t, jnp.maximum(e1, 0))
    rr = _gather_cols(rel_t, jnp.maximum(eb, 0))
    loss_edges = _mlp_ce([a0, a1, rr],
                         rw1_ref[...], rb1_ref[...], rw2_ref[...], rb2_ref[...],
                         rw3_ref[...], rb3_ref[...],
                         jnp.maximum(elab_i, 0).astype(f32), evalid, 20.0)

    # ---- connection loss: gather endpoints, 3-layer MLP, unweighted CE ----
    c = c_ref[...]                                           # [3, Mk] int32
    c0, c1, klab_i = c[0:1, :], c[1:2, :], c[2:3, :]
    kvalid = (c0 >= 0).astype(f32)
    g0 = _gather_cols(obj_t, jnp.maximum(c0, 0))
    g1 = _gather_cols(obj_t, jnp.maximum(c1, 0))
    loss_conns = _mlp_ce([g0, g1],
                         cw1_ref[...], cb1_ref[...], cw2_ref[...], cb2_ref[...],
                         cw3_ref[...], cb3_ref[...],
                         jnp.maximum(klab_i, 0).astype(f32), kvalid, 1.0)

    total = (WEIGHT_DICT["class"] * loss_class + WEIGHT_DICT["nodes"] * loss_nodes
             + WEIGHT_DICT["edges"] * loss_edges + WEIGHT_DICT["conns"] * loss_conns)

    lane = jax.lax.broadcasted_iota(jnp.int32, (1, _OUT_LANES), 1)
    out_ref[...] = ((lane == 0).astype(f32) * loss_class
                    + (lane == 1).astype(f32) * loss_nodes
                    + (lane == 2).astype(f32) * loss_edges
                    + (lane == 3).astype(f32) * loss_conns
                    + (lane == 4).astype(f32) * total)


def _full_spec(shape):
    return pl.BlockSpec(shape, lambda i: (0,) * len(shape))


def _fused_losses(arrays):
    return pl.pallas_call(
        _fused_loss_kernel,
        grid=(1,),
        in_specs=[_full_spec(a.shape) for a in arrays],
        out_specs=_full_spec((1, _OUT_LANES)),
        out_shape=jax.ShapeDtypeStruct((1, _OUT_LANES), jnp.float32),
        compiler_params=pltpu.CompilerParams(dimension_semantics=("arbitrary",)),
    )(*arrays)


# ----------------------------------------------------------------------------- #
# Device-side layout plumbing + kernel call (single jit'd dispatch)
# ----------------------------------------------------------------------------- #
@functools.partial(jax.jit, static_argnames=("obj_token", "rln_token"))
def _device_forward(h, pred_logits, pred_nodes, cls_label, node_idx, node_tgt,
                    e_pack, c_pack, rel_params, conn_params, obj_token, rln_token):
    del rln_token  # TODO(synk): rln_token == 0 branch (edge features without the
    #               relation token) of the reference is not implemented.
    B, NQ, _ = pred_logits.shape
    hid = h.shape[-1]
    nflat = B * NQ
    mc = cls_label.shape[-1]

    # lane-dense (feature-major, M-on-lanes) operands
    cls_logits_t = jnp.zeros((2, mc), jnp.float32)
    cls_logits_t = cls_logits_t.at[:, :nflat].set(
        pred_logits.reshape(nflat, -1).astype(jnp.float32).T)
    pred2_t = pred_nodes[..., :2].reshape(nflat, 2).astype(jnp.float32).T   # [2, B*NQ]
    obj_t = h[:, :obj_token, :].reshape(B * obj_token, hid).astype(jnp.float32).T
    rel_t = h[:, obj_token, :].astype(jnp.float32).T                        # [hid, B]

    rw1, rb1, rw2, rb2, rw3, rb3 = [p.astype(jnp.float32) for p in rel_params]
    cw1, cb1, cw2, cb2, cw3, cb3 = [p.astype(jnp.float32) for p in conn_params]

    arrays = (cls_logits_t, cls_label.astype(jnp.int32),
              pred2_t, node_tgt.astype(jnp.float32), node_idx.astype(jnp.int32),
              obj_t, rel_t, e_pack.astype(jnp.int32), c_pack.astype(jnp.int32),
              rw1.T, rb1.T, rw2.T, rb2.T, rw3.T, rb3.T,
              cw1.T, cb1.T, cw2.T, cb2.T, cw3.T, cb3.T)
    res = _fused_losses(arrays)
    return {"class": res[0, 0], "nodes": res[0, 1], "edges": res[0, 2],
            "conns": res[0, 3], "total": res[0, 4]}


# ----------------------------------------------------------------------------- #
# Host-side glue: matcher, graph bookkeeping -> small static padded int metadata
# ----------------------------------------------------------------------------- #
def simple_matcher(num_targets_per_batch):
    # TODO(synk): the reference uses Hungarian matching (scipy linear_sum_assignment)
    # on the host; a deterministic identity matching is used here instead.
    return [(np.arange(n, dtype=np.int64), np.arange(n, dtype=np.int64))
            for n in num_targets_per_batch]


def _shortest_paths(nodes, edges):
    """BFS all-pairs shortest path lengths (replaces networkx)."""
    adj = {int(n): set() for n in nodes}
    for a, b in edges:
        a, b = int(a), int(b)
        adj[a].add(b)
        adj[b].add(a)
    spl = {}
    for s in adj:
        dist = {s: 0}
        frontier = [s]
        while frontier:
            nxt = []
            for u in frontier:
                for v in adj[u]:
                    if v not in dist:
                        dist[v] = dist[u] + 1
                        nxt.append(v)
            frontier = nxt
        spl[s] = dist
    return spl


def _build_host_metadata(num_queries, obj_token, target_nodes, target_edges, indices):
    B = len(target_nodes)

    # class labels over the flat [B * num_queries] prediction grid
    flat = np.zeros((B, num_queries), np.int32)
    for b, (src, _) in enumerate(indices):
        if len(src) > 0:
            flat[b, np.asarray(src, np.int64)] = 1
    cls_label = flat.reshape(-1)

    # node loss pairs: (flat pred row, target xy)
    node_rows, node_xy = [], []
    for b, (src, tgt) in enumerate(indices):
        tn = np.asarray(target_nodes[b], np.float32)
        for s, t in zip(src, tgt):
            node_rows.append(b * num_queries + int(s))
            node_xy.append(tn[int(t), :2])

    e_rows, c_rows = [], []
    for b in range(B):
        src, tgt = indices[b]
        n = int(np.asarray(target_nodes[b]).shape[0])
        tgt_set = set(int(x) for x in tgt)
        remap = {int(x): i for i, x in enumerate(tgt)}
        pos = [e for e in target_edges[b]
               if int(e[0]) in tgt_set and int(e[1]) in tgt_set]
        pos = np.array([[remap[int(a)], remap[int(c)]] for a, c in pos],
                       dtype=np.int64).reshape(-1, 2)

        if n != 0:
            adj = np.ones((n, n)) - np.eye(n)
            if pos.shape[0] > 0:
                adj[pos[:, 0], pos[:, 1]] = 0
                adj[pos[:, 1], pos[:, 0]] = 0
            neg = np.stack(np.nonzero(np.triu(adj)), axis=-1).astype(np.int64)
        else:
            # TODO(synk): reference samples 5 random negative edges here; zeros kept
            # for determinism.
            neg = np.zeros((5, 2), dtype=np.int64)

        # TODO(synk): reference randomly flips edge direction with np.random; omitted
        # for determinism.

        if n != 0 and pos.shape[0] > 0:
            nodes_order = []
            for a, c in pos:
                if int(a) not in nodes_order:
                    nodes_order.append(int(a))
                if int(c) not in nodes_order:
                    nodes_order.append(int(c))
            spl = _shortest_paths(nodes_order, pos)
            conns, clab = [], []
            for ix, i in enumerate(nodes_order):
                for j in nodes_order[ix + 1:]:
                    conns.append((i, j))
                    clab.append(1 if (j in spl[i] and spl[i][j] < 5) else 0)
        else:
            nodes_order = sorted(set(int(x) for x in neg.reshape(-1)))
            conns, clab = [], []
            for ix, i in enumerate(nodes_order):
                for j in nodes_order[ix + 1:]:
                    conns.append((i, j))
                    clab.append(0)

        if len(src) > 0:
            src_np = np.asarray(src, np.int64)

            def to_row(j, _s=src_np, _b=b):
                return _b * obj_token + int(_s[int(j)])
        else:
            def to_row(j, _b=b):
                return _b * obj_token + int(j)

        all_edges = np.concatenate([pos, neg], axis=0) if n != 0 else neg
        n_pos = pos.shape[0] if n != 0 else 0
        for idx_e, (a, c) in enumerate(all_edges):
            e_rows.append((to_row(a), to_row(c), b, 1 if idx_e < n_pos else 0))
        for (a, c), lab in zip(conns, clab):
            c_rows.append((to_row(a), to_row(c), int(lab)))

    return cls_label, node_rows, node_xy, e_rows, c_rows


def _pad_metadata(cls_label, node_rows, node_xy, e_rows, c_rows):
    mc = _pad_len(cls_label.shape[0])
    cls = np.full((1, mc), -1, np.int32)
    cls[0, :cls_label.shape[0]] = cls_label

    mn = _pad_len(len(node_rows))
    nidx = np.full((1, mn), -1, np.int32)
    ntgt = np.zeros((2, mn), np.float32)
    if node_rows:
        nidx[0, :len(node_rows)] = np.asarray(node_rows, np.int32)
        ntgt[:, :len(node_rows)] = np.asarray(node_xy, np.float32).T

    me = _pad_len(len(e_rows))
    epack = np.full((4, me), -1, np.int32)
    if e_rows:
        epack[:, :len(e_rows)] = np.asarray(e_rows, np.int32).T

    mk = _pad_len(len(c_rows))
    cpack = np.full((3, mk), -1, np.int32)
    if c_rows:
        cpack[:, :len(c_rows)] = np.asarray(c_rows, np.int32).T

    return cls, nidx, ntgt, epack, cpack


def set_criterion_forward(h, pred_logits, pred_nodes, target_nodes, target_edges,
                          rel_params, conn_params, obj_token, rln_token):
    indices = simple_matcher([int(np.asarray(t).shape[0]) for t in target_nodes])
    meta = _build_host_metadata(int(pred_logits.shape[1]), obj_token,
                                target_nodes, target_edges, indices)
    cls_label, node_idx, node_tgt, e_pack, c_pack = _pad_metadata(*meta)
    return _device_forward(h, pred_logits, pred_nodes,
                           cls_label, node_idx, node_tgt, e_pack, c_pack,
                           tuple(rel_params), tuple(conn_params),
                           obj_token=obj_token, rln_token=rln_token)


# ----------------------------------------------------------------------------- #
# Deterministic parameter init + example run
# ----------------------------------------------------------------------------- #
def init_mlp_params(key, dims):
    params = []
    for din, dout in zip(dims[:-1], dims[1:]):
        key, k1, k2 = jax.random.split(key, 3)
        params.append(jax.random.normal(k1, (din, dout), jnp.float32)
                      * (1.0 / np.sqrt(din)))
        params.append(jax.random.normal(k2, (1, dout), jnp.float32) * 0.01)
    return params


if __name__ == "__main__":
    key = jax.random.PRNGKey(0)
    B, OBJ, RLN, HID = 2, 8, 1, 32
    ks = jax.random.split(key, 8)

    h = jax.random.normal(ks[0], (B, OBJ + RLN, HID), jnp.float32)
    pred_logits = jax.random.normal(ks[1], (B, OBJ, 2), jnp.float32)
    pred_nodes = jax.nn.sigmoid(jax.random.normal(ks[2], (B, OBJ, 4), jnp.float32))

    target_nodes = [
        np.asarray(jax.random.uniform(ks[3], (4, 2), jnp.float32)),
        np.asarray(jax.random.uniform(ks[4], (5, 2), jnp.float32)),
    ]
    target_edges = [
        np.array([[0, 1], [1, 2], [2, 3]], dtype=np.int64),
        np.array([[0, 1], [1, 2], [3, 4]], dtype=np.int64),
    ]

    rel_params = init_mlp_params(ks[5], (3 * HID, HID, HID, 2))    # relation_embed
    conn_params = init_mlp_params(ks[6], (2 * HID, HID, HID, 2))   # connection_embed

    losses = set_criterion_forward(h, pred_logits, pred_nodes, target_nodes,
                                   target_edges, rel_params, conn_params, OBJ, RLN)
    jax.block_until_ready(losses["total"])
    print("KERNEL_OK")
</pallas_src>

<mosaic_0001>
module attributes {stable_mosaic.version = 11 : i64} {
  func.func @_fused_loss_kernel(%arg0: i32, %arg1: memref<2x128xf32, #tpu.memory_space<vmem>>, %arg2: memref<1x128xi32, #tpu.memory_space<vmem>>, %arg3: memref<2x16xf32, #tpu.memory_space<vmem>>, %arg4: memref<2x128xf32, #tpu.memory_space<vmem>>, %arg5: memref<1x128xi32, #tpu.memory_space<vmem>>, %arg6: memref<32x16xf32, #tpu.memory_space<vmem>>, %arg7: memref<32x2xf32, #tpu.memory_space<vmem>>, %arg8: memref<4x128xi32, #tpu.memory_space<vmem>>, %arg9: memref<3x128xi32, #tpu.memory_space<vmem>>, %arg10: memref<32x96xf32, #tpu.memory_space<vmem>>, %arg11: memref<32x1xf32, #tpu.memory_space<vmem>>, %arg12: memref<32x32xf32, #tpu.memory_space<vmem>>, %arg13: memref<32x1xf32, #tpu.memory_space<vmem>>, %arg14: memref<2x32xf32, #tpu.memory_space<vmem>>, %arg15: memref<2x1xf32, #tpu.memory_space<vmem>>, %arg16: memref<32x64xf32, #tpu.memory_space<vmem>>, %arg17: memref<32x1xf32, #tpu.memory_space<vmem>>, %arg18: memref<32x32xf32, #tpu.memory_space<vmem>>, %arg19: memref<32x1xf32, #tpu.memory_space<vmem>>, %arg20: memref<2x32xf32, #tpu.memory_space<vmem>>, %arg21: memref<2x1xf32, #tpu.memory_space<vmem>>, %arg22: memref<1x128xf32, #tpu.memory_space<vmem>>) attributes {dimension_semantics = [#tpu.dimension_semantics<arbitrary>], iteration_bounds = array<i64: 1>, scalar_prefetch = 0 : i64, scratch_operands = 0 : i64, tpu.core_type = #tpu.core_type<tc>, window_params = [{pipeline_mode = #tpu.pipeline_mode<synchronous>, transform_indices = @transform_0, window_bounds = array<i64: 2, 128>}, {pipeline_mode = #tpu.pipeline_mode<synchronous>, transform_indices = @transform_1, window_bounds = array<i64: 1, 128>}, {pipeline_mode = #tpu.pipeline_mode<synchronous>, transform_indices = @transform_2, window_bounds = array<i64: 2, 16>}, {pipeline_mode = #tpu.pipeline_mode<synchronous>, transform_indices = @transform_3, window_bounds = array<i64: 2, 128>}, {pipeline_mode = #tpu.pipeline_mode<synchronous>, transform_indices = @transform_4, window_bounds = array<i64: 1, 128>}, {pipeline_mode = #tpu.pipeline_mode<synchronous>, transform_indices = @transform_5, window_bounds = array<i64: 32, 16>}, {pipeline_mode = #tpu.pipeline_mode<synchronous>, transform_indices = @transform_6, window_bounds = array<i64: 32, 2>}, {pipeline_mode = #tpu.pipeline_mode<synchronous>, transform_indices = @transform_7, window_bounds = array<i64: 4, 128>}, {pipeline_mode = #tpu.pipeline_mode<synchronous>, transform_indices = @transform_8, window_bounds = array<i64: 3, 128>}, {pipeline_mode = #tpu.pipeline_mode<synchronous>, transform_indices = @transform_9, window_bounds = array<i64: 32, 96>}, {pipeline_mode = #tpu.pipeline_mode<synchronous>, transform_indices = @transform_10, window_bounds = array<i64: 32, 1>}, {pipeline_mode = #tpu.pipeline_mode<synchronous>, transform_indices = @transform_11, window_bounds = array<i64: 32, 32>}, {pipeline_mode = #tpu.pipeline_mode<synchronous>, transform_indices = @transform_12, window_bounds = array<i64: 32, 1>}, {pipeline_mode = #tpu.pipeline_mode<synchronous>, transform_indices = @transform_13, window_bounds = array<i64: 2, 32>}, {pipeline_mode = #tpu.pipeline_mode<synchronous>, transform_indices = @transform_14, window_bounds = array<i64: 2, 1>}, {pipeline_mode = #tpu.pipeline_mode<synchronous>, transform_indices = @transform_15, window_bounds = array<i64: 32, 64>}, {pipeline_mode = #tpu.pipeline_mode<synchronous>, transform_indices = @transform_16, window_bounds = array<i64: 32, 1>}, {pipeline_mode = #tpu.pipeline_mode<synchronous>, transform_indices = @transform_17, window_bounds = array<i64: 32, 32>}, {pipeline_mode = #tpu.pipeline_mode<synchronous>, transform_indices = @transform_18, window_bounds = array<i64: 32, 1>}, {pipeline_mode = #tpu.pipeline_mode<synchronous>, transform_indices = @transform_19, window_bounds = array<i64: 2, 32>}, {pipeline_mode = #tpu.pipeline_mode<synchronous>, transform_indices = @transform_20, window_bounds = array<i64: 2, 1>}, {pipeline_mode = #tpu.pipeline_mode<synchronous>, transform_indices = @transform_21, window_bounds = array<i64: 1, 128>}]} {
    %c0 = arith.constant 0 : index
    %c0_0 = arith.constant 0 : index
    %0 = vector.load %arg1[%c0, %c0_0] : memref<2x128xf32, #tpu.memory_space<vmem>>, vector<2x128xf32>
    %1 = vector.extract_strided_slice %0 {offsets = [1, 0], sizes = [1, 128], strides = [1, 1]} : vector<2x128xf32> to vector<1x128xf32>
    %2 = vector.extract_strided_slice %0 {offsets = [0, 0], sizes = [1, 128], strides = [1, 1]} : vector<2x128xf32> to vector<1x128xf32>
    %3 = arith.subf %1, %2 : vector<1x128xf32>
    %c0_1 = arith.constant 0 : index
    %c0_2 = arith.constant 0 : index
    %4 = vector.load %arg2[%c0_1, %c0_2] : memref<1x128xi32, #tpu.memory_space<vmem>>, vector<1x128xi32>
    %c0_i32 = arith.constant 0 : i32
    %5 = vector.broadcast %c0_i32 : i32 to vector<1x128xi32>
    %6 = arith.cmpi sge, %4, %5 : vector<1x128xi32>
    %7 = arith.extui %6 : vector<1x128xi1> to vector<1x128xi32>
    %8 = arith.sitofp %7 : vector<1x128xi32> to vector<1x128xf32>
    %c0_i32_3 = arith.constant 0 : i32
    %9 = vector.broadcast %c0_i32_3 : i32 to vector<1x128xi32>
    %10 = arith.maxsi %4, %9 : vector<1x128xi32>
    %11 = arith.sitofp %10 : vector<1x128xi32> to vector<1x128xf32>
    %cst = arith.constant 5.000000e-01 : f32
    %12 = vector.broadcast %cst : f32 to vector<1x128xf32>
    %13 = arith.cmpf ogt, %11, %12 : vector<1x128xf32>
    %cst_4 = arith.constant 8.000000e-01 : f32
    %cst_5 = arith.constant 2.000000e-01 : f32
    %14 = vector.broadcast %cst_4 : f32 to vector<1x128xf32>
    %15 = vector.broadcast %cst_5 : f32 to vector<1x128xf32>
    %16 = arith.select %13, %14, %15 : vector<1x128xi1>, vector<1x128xf32>
    %17 = arith.mulf %16, %8 : vector<1x128xf32>
    %cst_6 = arith.constant 0.000000e+00 : f32
    %18 = vector.broadcast %cst_6 : f32 to vector<1x128xf32>
    %19 = arith.maximumf %3, %18 : vector<1x128xf32>
    %20 = arith.mulf %3, %11 : vector<1x128xf32>
    %21 = arith.subf %19, %20 : vector<1x128xf32>
    %22 = math.absf %3 : vector<1x128xf32>
    %cst_7 = arith.constant 0.000000e+00 : f32
    %23 = vector.broadcast %cst_7 : f32 to vector<1x128xf32>
    %24 = arith.subf %23, %22 : vector<1x128xf32>
    %25 = math.exp %24 : vector<1x128xf32>
    %cst_8 = arith.constant 1.000000e+00 : f32
    %26 = vector.broadcast %cst_8 : f32 to vector<1x128xf32>
    %27 = arith.addf %26, %25 : vector<1x128xf32>
    %28 = math.log %27 : vector<1x128xf32>
    %29 = arith.addf %21, %28 : vector<1x128xf32>
    %30 = arith.mulf %17, %29 : vector<1x128xf32>
    %cst_9 = arith.constant dense<0.000000e+00> : vector<1xf32>
    %31 = vector.multi_reduction <add>, %30, %cst_9 [1] : vector<1x128xf32> to vector<1xf32>
    %32 = vector.shape_cast %31 : vector<1xf32> to vector<1x1xf32>
    %cst_10 = arith.constant dense<0.000000e+00> : vector<1xf32>
    %33 = vector.multi_reduction <add>, %32, %cst_10 [0] : vector<1x1xf32> to vector<1xf32>
    %34 = vector.shape_cast %33 : vector<1xf32> to vector<1x1xf32>
    %cst_11 = arith.constant dense<0.000000e+00> : vector<1xf32>
    %35 = vector.multi_reduction <add>, %17, %cst_11 [1] : vector<1x128xf32> to vector<1xf32>
    %36 = vector.shape_cast %35 : vector<1xf32> to vector<1x1xf32>
    %cst_12 = arith.constant dense<0.000000e+00> : vector<1xf32>
    %37 = vector.multi_reduction <add>, %36, %cst_12 [0] : vector<1x1xf32> to vector<1xf32>
    %38 = vector.shape_cast %37 : vector<1xf32> to vector<1x1xf32>
    %cst_13 = arith.constant 0.000000e+00 : f32
    %39 = vector.broadcast %cst_13 : f32 to vector<1x1xf32>
    %40 = arith.cmpf ogt, %38, %39 : vector<1x1xf32>
    %cst_14 = arith.constant 1.000000e+00 : f32
    %41 = vector.broadcast %cst_14 : f32 to vector<1x1xf32>
    %42 = arith.select %40, %38, %41 : vector<1x1xi1>, vector<1x1xf32>
    %43 = tpu.reciprocal %42 {approx = true} : vector<1x1xf32> -> vector<1x1xf32>
    %44 = arith.mulf %34, %43 : vector<1x1xf32>
    %c0_15 = arith.constant 0 : index
    %c0_16 = arith.constant 0 : index
    %45 = vector.load %arg5[%c0_15, %c0_16] : memref<1x128xi32, #tpu.memory_space<vmem>>, vector<1x128xi32>
    %c0_i32_17 = arith.constant 0 : i32
    %46 = vector.broadcast %c0_i32_17 : i32 to vector<1x128xi32>
    %47 = arith.cmpi sge, %45, %46 : vector<1x128xi32>
    %48 = arith.extui %47 : vector<1x128xi1> to vector<1x128xi32>
    %49 = arith.sitofp %48 : vector<1x128xi32> to vector<1x128xf32>
    %c0_18 = arith.constant 0 : index
    %c0_19 = arith.constant 0 : index
    %50 = vector.load %arg3[%c0_18, %c0_19] : memref<2x16xf32, #tpu.memory_space<vmem>>, vector<2x16xf32>
    %c0_i32_20 = arith.constant 0 : i32
    %51 = vector.broadcast %c0_i32_20 : i32 to vector<1x128xi32>
    %52 = arith.maxsi %45, %51 : vector<1x128xi32>
    %53 = tpu.iota {dimensions = array<i32: 0>} : vector<16x128xi32>
    %54 = vector.broadcast %52 : vector<1x128xi32> to vector<16x128xi32>
    %55 = arith.cmpi eq, %53, %54 : vector<16x128xi32>
    %56 = arith.extui %55 : vector<16x128xi1> to vector<16x128xi32>
    %57 = arith.sitofp %56 : vector<16x128xi32> to vector<16x128xf32>
    %cst_21 = arith.constant dense<0.000000e+00> : vector<2x128xf32>
    %58 = tpu.matmul %50, %57, %cst_21 {dimension_numbers = #tpu.dot_dimension_numbers<[1], [0], [0], [1], [0, 0, 1, 1], [], []>} : vector<2x16xf32>, vector<16x128xf32>, vector<2x128xf32> -> vector<2x128xf32>
    %c0_22 = arith.constant 0 : index
    %c0_23 = arith.constant 0 : index
    %59 = vector.load %arg4[%c0_22, %c0_23] : memref<2x128xf32, #tpu.memory_space<vmem>>, vector<2x128xf32>
    %60 = arith.subf %58, %59 : vector<2x128xf32>
    %61 = math.absf %60 : vector<2x128xf32>
    %62 = vector.broadcast %49 : vector<1x128xf32> to vector<2x128xf32>
    %63 = arith.mulf %61, %62 : vector<2x128xf32>
    %cst_24 = arith.constant dense<0.000000e+00> : vector<1xf32>
    %64 = vector.multi_reduction <add>, %49, %cst_24 [1] : vector<1x128xf32> to vector<1xf32>
    %65 = vector.shape_cast %64 : vector<1xf32> to vector<1x1xf32>
    %cst_25 = arith.constant dense<0.000000e+00> : vector<1xf32>
    %66 = vector.multi_reduction <add>, %65, %cst_25 [0] : vector<1x1xf32> to vector<1xf32>
    %67 = vector.shape_cast %66 : vector<1xf32> to vector<1x1xf32>
    %cst_26 = arith.constant 0.000000e+00 : f32
    %68 = vector.broadcast %cst_26 : f32 to vector<1x1xf32>
    %69 = arith.cmpf ogt, %67, %68 : vector<1x1xf32>
    %cst_27 = arith.constant 1.000000e+00 : f32
    %70 = vector.broadcast %cst_27 : f32 to vector<1x1xf32>
    %71 = arith.select %69, %67, %70 : vector<1x1xi1>, vector<1x1xf32>
    %cst_28 = arith.constant dense<0.000000e+00> : vector<2xf32>
    %72 = vector.multi_reduction <add>, %63, %cst_28 [1] : vector<2x128xf32> to vector<2xf32>
    %73 = vector.shape_cast %72 : vector<2xf32> to vector<2x1xf32>
    %cst_29 = arith.constant dense<0.000000e+00> : vector<1xf32>
    %74 = vector.multi_reduction <add>, %73, %cst_29 [0] : vector<2x1xf32> to vector<1xf32>
    %75 = vector.shape_cast %74 : vector<1xf32> to vector<1x1xf32>
    %76 = tpu.reciprocal %71 {approx = true} : vector<1x1xf32> -> vector<1x1xf32>
    %77 = arith.mulf %75, %76 : vector<1x1xf32>
    %c0_30 = arith.constant 0 : index
    %c0_31 = arith.constant 0 : index
    %78 = vector.load %arg6[%c0_30, %c0_31] : memref<32x16xf32, #tpu.memory_space<vmem>>, vector<32x16xf32>
    %c0_32 = arith.constant 0 : index
    %c0_33 = arith.constant 0 : index
    %79 = vector.load %arg7[%c0_32, %c0_33] : memref<32x2xf32, #tpu.memory_space<vmem>>, vector<32x2xf32>
    %c0_34 = arith.constant 0 : index
    %c0_35 = arith.constant 0 : index
    %80 = vector.load %arg8[%c0_34, %c0_35] : memref<4x128xi32, #tpu.memory_space<vmem>>, vector<4x128xi32>
    %81 = vector.extract_strided_slice %80 {offsets = [0, 0], sizes = [1, 128], strides = [1, 1]} : vector<4x128xi32> to vector<1x128xi32>
    %82 = vector.extract_strided_slice %80 {offsets = [1, 0], sizes = [1, 128], strides = [1, 1]} : vector<4x128xi32> to vector<1x128xi32>
    %83 = vector.extract_strided_slice %80 {offsets = [2, 0], sizes = [1, 128], strides = [1, 1]} : vector<4x128xi32> to vector<1x128xi32>
    %84 = vector.extract_strided_slice %80 {offsets = [3, 0], sizes = [1, 128], strides = [1, 1]} : vector<4x128xi32> to vector<1x128xi32>
    %c0_i32_36 = arith.constant 0 : i32
    %85 = vector.broadcast %c0_i32_36 : i32 to vector<1x128xi32>
    %86 = arith.cmpi sge, %81, %85 : vector<1x128xi32>
    %87 = arith.extui %86 : vector<1x128xi1> to vector<1x128xi32>
    %88 = arith.sitofp %87 : vector<1x128xi32> to vector<1x128xf32>
    %c0_i32_37 = arith.constant 0 : i32
    %89 = vector.broadcast %c0_i32_37 : i32 to vector<1x128xi32>
    %90 = arith.maxsi %81, %89 : vector<1x128xi32>
    %91 = tpu.iota {dimensions = array<i32: 0>} : vector<16x128xi32>
    %92 = vector.broadcast %90 : vector<1x128xi32> to vector<16x128xi32>
    %93 = arith.cmpi eq, %91, %92 : vector<16x128xi32>
    %94 = arith.extui %93 : vector<16x128xi1> to vector<16x128xi32>
    %95 = arith.sitofp %94 : vector<16x128xi32> to vector<16x128xf32>
    %cst_38 = arith.constant dense<0.000000e+00> : vector<32x128xf32>
    %96 = tpu.matmul %78, %95, %cst_38 {dimension_numbers = #tpu.dot_dimension_numbers<[1], [0], [0], [1], [0, 0, 1, 1], [], []>} : vector<32x16xf32>, vector<16x128xf32>, vector<32x128xf32> -> vector<32x128xf32>
    %c0_i32_39 = arith.constant 0 : i32
    %97 = vector.broadcast %c0_i32_39 : i32 to vector<1x128xi32>
    %98 = arith.maxsi %82, %97 : vector<1x128xi32>
    %99 = tpu.iota {dimensions = array<i32: 0>} : vector<16x128xi32>
    %100 = vector.broadcast %98 : vector<1x128xi32> to vector<16x128xi32>
    %101 = arith.cmpi eq, %99, %100 : vector<16x128xi32>
    %102 = arith.extui %101 : vector<16x128xi1> to vector<16x128xi32>
    %103 = arith.sitofp %102 : vector<16x128xi32> to vector<16x128xf32>
    %cst_40 = arith.constant dense<0.000000e+00> : vector<32x128xf32>
    %104 = tpu.matmul %78, %103, %cst_40 {dimension_numbers = #tpu.dot_dimension_numbers<[1], [0], [0], [1], [0, 0, 1, 1], [], []>} : vector<32x16xf32>, vector<16x128xf32>, vector<32x128xf32> -> vector<32x128xf32>
    %c0_i32_41 = arith.constant 0 : i32
    %105 = vector.broadcast %c0_i32_41 : i32 to vector<1x128xi32>
    %106 = arith.maxsi %83, %105 : vector<1x128xi32>
    %107 = tpu.iota {dimensions = array<i32: 0>} : vector<2x128xi32>
    %108 = vector.broadcast %106 : vector<1x128xi32> to vector<2x128xi32>
    %109 = arith.cmpi eq, %107, %108 : vector<2x128xi32>
    %110 = arith.extui %109 : vector<2x128xi1> to vector<2x128xi32>
    %111 = arith.sitofp %110 : vector<2x128xi32> to vector<2x128xf32>
    %cst_42 = arith.constant dense<0.000000e+00> : vector<32x128xf32>
    %112 = tpu.matmul %79, %111, %cst_42 {dimension_numbers = #tpu.dot_dimension_numbers<[1], [0], [0], [1], [0, 0, 1, 1], [], []>} : vector<32x2xf32>, vector<2x128xf32>, vector<32x128xf32> -> vector<32x128xf32>
    %c0_43 = arith.constant 0 : index
    %c0_44 = arith.constant 0 : index
    %113 = vector.load %arg10[%c0_43, %c0_44] : memref<32x96xf32, #tpu.memory_space<vmem>>, vector<32x96xf32>
    %c0_45 = arith.constant 0 : index
    %c0_46 = arith.constant 0 : index
    %114 = vector.load %arg11[%c0_45, %c0_46] : memref<32x1xf32, #tpu.memory_space<vmem>>, vector<32x1xf32>
    %c0_47 = arith.constant 0 : index
    %c0_48 = arith.constant 0 : index
    %115 = vector.load %arg12[%c0_47, %c0_48] : memref<32x32xf32, #tpu.memory_space<vmem>>, vector<32x32xf32>
    %c0_49 = arith.constant 0 : index
    %c0_50 = arith.constant 0 : index
    %116 = vector.load %arg13[%c0_49, %c0_50] : memref<32x1xf32, #tpu.memory_space<vmem>>, vector<32x1xf32>
    %c0_51 = arith.constant 0 : index
    %c0_52 = arith.constant 0 : index
    %117 = vector.load %arg14[%c0_51, %c0_52] : memref<2x32xf32, #tpu.memory_space<vmem>>, vector<2x32xf32>
    %c0_53 = arith.constant 0 : index
    %c0_54 = arith.constant 0 : index
    %118 = vector.load %arg15[%c0_53, %c0_54] : memref<2x1xf32, #tpu.memory_space<vmem>>, vector<2x1xf32>
    %c0_i32_55 = arith.constant 0 : i32
    %119 = vector.broadcast %c0_i32_55 : i32 to vector<1x128xi32>
    %120 = arith.maxsi %84, %119 : vector<1x128xi32>
    %121 = arith.sitofp %120 : vector<1x128xi32> to vector<1x128xf32>
    %122 = tpu.concatenate %96, %104, %112 in 0 : vector<32x128xf32>, vector<32x128xf32>, vector<32x128xf32> -> vector<96x128xf32>
    %cst_56 = arith.constant dense<0.000000e+00> : vector<32x128xf32>
    %123 = tpu.matmul %113, %122, %cst_56 {dimension_numbers = #tpu.dot_dimension_numbers<[1], [0], [0], [1], [0, 0, 1, 1], [], []>} : vector<32x96xf32>, vector<96x128xf32>, vector<32x128xf32> -> vector<32x128xf32>
    %124 = vector.broadcast %114 : vector<32x1xf32> to vector<32x128xf32>
    %125 = arith.addf %123, %124 : vector<32x128xf32>
    %cst_57 = arith.constant 0.000000e+00 : f32
    %126 = vector.broadcast %cst_57 : f32 to vector<32x128xf32>
    %127 = arith.maximumf %125, %126 : vector<32x128xf32>
    %cst_58 = arith.constant dense<0.000000e+00> : vector<32x128xf32>
    %128 = tpu.matmul %115, %127, %cst_58 {dimension_numbers = #tpu.dot_dimension_numbers<[1], [0], [0], [1], [0, 0, 1, 1], [], []>} : vector<32x32xf32>, vector<32x128xf32>, vector<32x128xf32> -> vector<32x128xf32>
    %129 = vector.broadcast %116 : vector<32x1xf32> to vector<32x128xf32>
    %130 = arith.addf %128, %129 : vector<32x128xf32>
    %cst_59 = arith.constant 0.000000e+00 : f32
    %131 = vector.broadcast %cst_59 : f32 to vector<32x128xf32>
    %132 = arith.maximumf %130, %131 : vector<32x128xf32>
    %cst_60 = arith.constant dense<0.000000e+00> : vector<2x128xf32>
    %133 = tpu.matmul %117, %132, %cst_60 {dimension_numbers = #tpu.dot_dimension_numbers<[1], [0], [0], [1], [0, 0, 1, 1], [], []>} : vector<2x32xf32>, vector<32x128xf32>, vector<2x128xf32> -> vector<2x128xf32>
    %134 = vector.broadcast %118 : vector<2x1xf32> to vector<2x128xf32>
    %135 = arith.addf %133, %134 : vector<2x128xf32>
    %136 = vector.extract_strided_slice %135 {offsets = [1, 0], sizes = [1, 128], strides = [1, 1]} : vector<2x128xf32> to vector<1x128xf32>
    %137 = vector.extract_strided_slice %135 {offsets = [0, 0], sizes = [1, 128], strides = [1, 1]} : vector<2x128xf32> to vector<1x128xf32>
    %138 = arith.subf %136, %137 : vector<1x128xf32>
    %cst_61 = arith.constant 0.000000e+00 : f32
    %139 = vector.broadcast %cst_61 : f32 to vector<1x128xf32>
    %140 = arith.maximumf %138, %139 : vector<1x128xf32>
    %141 = arith.mulf %138, %121 : vector<1x128xf32>
    %142 = arith.subf %140, %141 : vector<1x128xf32>
    %143 = math.absf %138 : vector<1x128xf32>
    %cst_62 = arith.constant 0.000000e+00 : f32
    %144 = vector.broadcast %cst_62 : f32 to vector<1x128xf32>
    %145 = arith.subf %144, %143 : vector<1x128xf32>
    %146 = math.exp %145 : vector<1x128xf32>
    %cst_63 = arith.constant 1.000000e+00 : f32
    %147 = vector.broadcast %cst_63 : f32 to vector<1x128xf32>
    %148 = arith.addf %147, %146 : vector<1x128xf32>
    %149 = math.log %148 : vector<1x128xf32>
    %150 = arith.addf %142, %149 : vector<1x128xf32>
    %cst_64 = arith.constant 5.000000e-01 : f32
    %151 = vector.broadcast %cst_64 : f32 to vector<1x128xf32>
    %152 = arith.cmpf ogt, %121, %151 : vector<1x128xf32>
    %cst_65 = arith.constant 2.000000e+01 : f32
    %cst_66 = arith.constant 1.000000e+00 : f32
    %153 = vector.broadcast %cst_65 : f32 to vector<1x128xf32>
    %154 = vector.broadcast %cst_66 : f32 to vector<1x128xf32>
    %155 = arith.select %152, %153, %154 : vector<1x128xi1>, vector<1x128xf32>
    %156 = arith.mulf %155, %88 : vector<1x128xf32>
    %157 = arith.mulf %156, %150 : vector<1x128xf32>
    %cst_67 = arith.constant dense<0.000000e+00> : vector<1xf32>
    %158 = vector.multi_reduction <add>, %157, %cst_67 [1] : vector<1x128xf32> to vector<1xf32>
    %159 = vector.shape_cast %158 : vector<1xf32> to vector<1x1xf32>
    %cst_68 = arith.constant dense<0.000000e+00> : vector<1xf32>
    %160 = vector.multi_reduction <add>, %159, %cst_68 [0] : vector<1x1xf32> to vector<1xf32>
    %161 = vector.shape_cast %160 : vector<1xf32> to vector<1x1xf32>
    %cst_69 = arith.constant dense<0.000000e+00> : vector<1xf32>
    %162 = vector.multi_reduction <add>, %156, %cst_69 [1] : vector<1x128xf32> to vector<1xf32>
    %163 = vector.shape_cast %162 : vector<1xf32> to vector<1x1xf32>
    %cst_70 = arith.constant dense<0.000000e+00> : vector<1xf32>
    %164 = vector.multi_reduction <add>, %163, %cst_70 [0] : vector<1x1xf32> to vector<1xf32>
    %165 = vector.shape_cast %164 : vector<1xf32> to vector<1x1xf32>
    %cst_71 = arith.constant 0.000000e+00 : f32
    %166 = vector.broadcast %cst_71 : f32 to vector<1x1xf32>
    %167 = arith.cmpf ogt, %165, %166 : vector<1x1xf32>
    %cst_72 = arith.constant 1.000000e+00 : f32
    %168 = vector.broadcast %cst_72 : f32 to vector<1x1xf32>
    %169 = arith.select %167, %165, %168 : vector<1x1xi1>, vector<1x1xf32>
    %170 = tpu.reciprocal %169 {approx = true} : vector<1x1xf32> -> vector<1x1xf32>
    %171 = arith.mulf %161, %170 : vector<1x1xf32>
    %c0_73 = arith.constant 0 : index
    %c0_74 = arith.constant 0 : index
    %172 = vector.load %arg9[%c0_73, %c0_74] : memref<3x128xi32, #tpu.memory_space<vmem>>, vector<3x128xi32>
    %173 = vector.extract_strided_slice %172 {offsets = [0, 0], sizes = [1, 128], strides = [1, 1]} : vector<3x128xi32> to vector<1x128xi32>
    %174 = vector.extract_strided_slice %172 {offsets = [1, 0], sizes = [1, 128], strides = [1, 1]} : vector<3x128xi32> to vector<1x128xi32>
    %175 = vector.extract_strided_slice %172 {offsets = [2, 0], sizes = [1, 128], strides = [1, 1]} : vector<3x128xi32> to vector<1x128xi32>
    %c0_i32_75 = arith.constant 0 : i32
    %176 = vector.broadcast %c0_i32_75 : i32 to vector<1x128xi32>
    %177 = arith.cmpi sge, %173, %176 : vector<1x128xi32>
    %178 = arith.extui %177 : vector<1x128xi1> to vector<1x128xi32>
    %179 = arith.sitofp %178 : vector<1x128xi32> to vector<1x128xf32>
    %c0_i32_76 = arith.constant 0 : i32
    %180 = vector.broadcast %c0_i32_76 : i32 to vector<1x128xi32>
    %181 = arith.maxsi %173, %180 : vector<1x128xi32>
    %182 = tpu.iota {dimensions = array<i32: 0>} : vector<16x128xi32>
    %183 = vector.broadcast %181 : vector<1x128xi32> to vector<16x128xi32>
    %184 = arith.cmpi eq, %182, %183 : vector<16x128xi32>
    %185 = arith.extui %184 : vector<16x128xi1> to vector<16x128xi32>
    %186 = arith.sitofp %185 : vector<16x128xi32> to vector<16x128xf32>
    %cst_77 = arith.constant dense<0.000000e+00> : vector<32x128xf32>
    %187 = tpu.matmul %78, %186, %cst_77 {dimension_numbers = #tpu.dot_dimension_numbers<[1], [0], [0], [1], [0, 0, 1, 1], [], []>} : vector<32x16xf32>, vector<16x128xf32>, vector<32x128xf32> -> vector<32x128xf32>
    %c0_i32_78 = arith.constant 0 : i32
    %188 = vector.broadcast %c0_i32_78 : i32 to vector<1x128xi32>
    %189 = arith.maxsi %174, %188 : vector<1x128xi32>
    %190 = tpu.iota {dimensions = array<i32: 0>} : vector<16x128xi32>
    %191 = vector.broadcast %189 : vector<1x128xi32> to vector<16x128xi32>
    %192 = arith.cmpi eq, %190, %191 : vector<16x128xi32>
    %193 = arith.extui %192 : vector<16x128xi1> to vector<16x128xi32>
    %194 = arith.sitofp %193 : vector<16x128xi32> to vector<16x128xf32>
    %cst_79 = arith.constant dense<0.000000e+00> : vector<32x128xf32>
    %195 = tpu.matmul %78, %194, %cst_79 {dimension_numbers = #tpu.dot_dimension_numbers<[1], [0], [0], [1], [0, 0, 1, 1], [], []>} : vector<32x16xf32>, vector<16x128xf32>, vector<32x128xf32> -> vector<32x128xf32>
    %c0_80 = arith.constant 0 : index
    %c0_81 = arith.constant 0 : index
    %196 = vector.load %arg16[%c0_80, %c0_81] : memref<32x64xf32, #tpu.memory_space<vmem>>, vector<32x64xf32>
    %c0_82 = arith.constant 0 : index
    %c0_83 = arith.constant 0 : index
    %197 = vector.load %arg17[%c0_82, %c0_83] : memref<32x1xf32, #tpu.memory_space<vmem>>, vector<32x1xf32>
    %c0_84 = arith.constant 0 : index
    %c0_85 = arith.constant 0 : index
    %198 = vector.load %arg18[%c0_84, %c0_85] : memref<32x32xf32, #tpu.memory_space<vmem>>, vector<32x32xf32>
    %c0_86 = arith.constant 0 : index
    %c0_87 = arith.constant 0 : index
    %199 = vector.load %arg19[%c0_86, %c0_87] : memref<32x1xf32, #tpu.memory_space<vmem>>, vector<32x1xf32>
    %c0_88 = arith.constant 0 : index
    %c0_89 = arith.constant 0 : index
    %200 = vector.load %arg20[%c0_88, %c0_89] : memref<2x32xf32, #tpu.memory_space<vmem>>, vector<2x32xf32>
    %c0_90 = arith.constant 0 : index
    %c0_91 = arith.constant 0 : index
    %201 = vector.load %arg21[%c0_90, %c0_91] : memref<2x1xf32, #tpu.memory_space<vmem>>, vector<2x1xf32>
    %c0_i32_92 = arith.constant 0 : i32
    %202 = vector.broadcast %c0_i32_92 : i32 to vector<1x128xi32>
    %203 = arith.maxsi %175, %202 : vector<1x128xi32>
    %204 = arith.sitofp %203 : vector<1x128xi32> to vector<1x128xf32>
    %205 = tpu.concatenate %187, %195 in 0 : vector<32x128xf32>, vector<32x128xf32> -> vector<64x128xf32>
    %cst_93 = arith.constant dense<0.000000e+00> : vector<32x128xf32>
    %206 = tpu.matmul %196, %205, %cst_93 {dimension_numbers = #tpu.dot_dimension_numbers<[1], [0], [0], [1], [0, 0, 1, 1], [], []>} : vector<32x64xf32>, vector<64x128xf32>, vector<32x128xf32> -> vector<32x128xf32>
    %207 = vector.broadcast %197 : vector<32x1xf32> to vector<32x128xf32>
    %208 = arith.addf %206, %207 : vector<32x128xf32>
    %cst_94 = arith.constant 0.000000e+00 : f32
    %209 = vector.broadcast %cst_94 : f32 to vector<32x128xf32>
    %210 = arith.maximumf %208, %209 : vector<32x128xf32>
    %cst_95 = arith.constant dense<0.000000e+00> : vector<32x128xf32>
    %211 = tpu.matmul %198, %210, %cst_95 {dimension_numbers = #tpu.dot_dimension_numbers<[1], [0], [0], [1], [0, 0, 1, 1], [], []>} : vector<32x32xf32>, vector<32x128xf32>, vector<32x128xf32> -> vector<32x128xf32>
    %212 = vector.broadcast %199 : vector<32x1xf32> to vector<32x128xf32>
    %213 = arith.addf %211, %212 : vector<32x128xf32>
    %cst_96 = arith.constant 0.000000e+00 : f32
    %214 = vector.broadcast %cst_96 : f32 to vector<32x128xf32>
    %215 = arith.maximumf %213, %214 : vector<32x128xf32>
    %cst_97 = arith.constant dense<0.000000e+00> : vector<2x128xf32>
    %216 = tpu.matmul %200, %215, %cst_97 {dimension_numbers = #tpu.dot_dimension_numbers<[1], [0], [0], [1], [0, 0, 1, 1], [], []>} : vector<2x32xf32>, vector<32x128xf32>, vector<2x128xf32> -> vector<2x128xf32>
    %217 = vector.broadcast %201 : vector<2x1xf32> to vector<2x128xf32>
    %218 = arith.addf %216, %217 : vector<2x128xf32>
    %219 = vector.extract_strided_slice %218 {offsets = [1, 0], sizes = [1, 128], strides = [1, 1]} : vector<2x128xf32> to vector<1x128xf32>
    %220 = vector.extract_strided_slice %218 {offsets = [0, 0], sizes = [1, 128], strides = [1, 1]} : vector<2x128xf32> to vector<1x128xf32>
    %221 = arith.subf %219, %220 : vector<1x128xf32>
    %cst_98 = arith.constant 0.000000e+00 : f32
    %222 = vector.broadcast %cst_98 : f32 to vector<1x128xf32>
    %223 = arith.maximumf %221, %222 : vector<1x128xf32>
    %224 = arith.mulf %221, %204 : vector<1x128xf32>
    %225 = arith.subf %223, %224 : vector<1x128xf32>
    %226 = math.absf %221 : vector<1x128xf32>
    %cst_99 = arith.constant 0.000000e+00 : f32
    %227 = vector.broadcast %cst_99 : f32 to vector<1x128xf32>
    %228 = arith.subf %227, %226 : vector<1x128xf32>
    %229 = math.exp %228 : vector<1x128xf32>
    %cst_100 = arith.constant 1.000000e+00 : f32
    %230 = vector.broadcast %cst_100 : f32 to vector<1x128xf32>
    %231 = arith.addf %230, %229 : vector<1x128xf32>
    %232 = math.log %231 : vector<1x128xf32>
    %233 = arith.addf %225, %232 : vector<1x128xf32>
    %cst_101 = arith.constant 5.000000e-01 : f32
    %234 = vector.broadcast %cst_101 : f32 to vector<1x128xf32>
    %235 = arith.cmpf ogt, %204, %234 : vector<1x128xf32>
    %cst_102 = arith.constant 1.000000e+00 : f32
    %cst_103 = arith.constant 1.000000e+00 : f32
    %236 = vector.broadcast %cst_102 : f32 to vector<1x128xf32>
    %237 = vector.broadcast %cst_103 : f32 to vector<1x128xf32>
    %238 = arith.select %235, %236, %237 : vector<1x128xi1>, vector<1x128xf32>
    %239 = arith.mulf %238, %179 : vector<1x128xf32>
    %240 = arith.mulf %239, %233 : vector<1x128xf32>
    %cst_104 = arith.constant dense<0.000000e+00> : vector<1xf32>
    %241 = vector.multi_reduction <add>, %240, %cst_104 [1] : vector<1x128xf32> to vector<1xf32>
    %242 = vector.shape_cast %241 : vector<1xf32> to vector<1x1xf32>
    %cst_105 = arith.constant dense<0.000000e+00> : vector<1xf32>
    %243 = vector.multi_reduction <add>, %242, %cst_105 [0] : vector<1x1xf32> to vector<1xf32>
    %244 = vector.shape_cast %243 : vector<1xf32> to vector<1x1xf32>
    %cst_106 = arith.constant dense<0.000000e+00> : vector<1xf32>
    %245 = vector.multi_reduction <add>, %239, %cst_106 [1] : vector<1x128xf32> to vector<1xf32>
    %246 = vector.shape_cast %245 : vector<1xf32> to vector<1x1xf32>
    %cst_107 = arith.constant dense<0.000000e+00> : vector<1xf32>
    %247 = vector.multi_reduction <add>, %246, %cst_107 [0] : vector<1x1xf32> to vector<1xf32>
    %248 = vector.shape_cast %247 : vector<1xf32> to vector<1x1xf32>
    %cst_108 = arith.constant 0.000000e+00 : f32
    %249 = vector.broadcast %cst_108 : f32 to vector<1x1xf32>
    %250 = arith.cmpf ogt, %248, %249 : vector<1x1xf32>
    %cst_109 = arith.constant 1.000000e+00 : f32
    %251 = vector.broadcast %cst_109 : f32 to vector<1x1xf32>
    %252 = arith.select %250, %248, %251 : vector<1x1xi1>, vector<1x1xf32>
    %253 = tpu.reciprocal %252 {approx = true} : vector<1x1xf32> -> vector<1x1xf32>
    %254 = arith.mulf %244, %253 : vector<1x1xf32>
    %cst_110 = arith.constant 3.000000e+00 : f32
    %255 = vector.broadcast %cst_110 : f32 to vector<1x1xf32>
    %256 = arith.mulf %255, %44 : vector<1x1xf32>
    %cst_111 = arith.constant 5.000000e+00 : f32
    %257 = vector.broadcast %cst_111 : f32 to vector<1x1xf32>
    %258 = arith.mulf %257, %77 : vector<1x1xf32>
    %259 = arith.addf %256, %258 : vector<1x1xf32>
    %cst_112 = arith.constant 4.000000e+00 : f32
    %260 = vector.broadcast %cst_112 : f32 to vector<1x1xf32>
    %261 = arith.mulf %260, %171 : vector<1x1xf32>
    %262 = arith.addf %259, %261 : vector<1x1xf32>
    %cst_113 = arith.constant 2.000000e+00 : f32
    %263 = vector.broadcast %cst_113 : f32 to vector<1x1xf32>
    %264 = arith.mulf %263, %254 : vector<1x1xf32>
    %265 = arith.addf %262, %264 : vector<1x1xf32>
    %266 = tpu.iota {dimensions = array<i32: 1>} : vector<1x128xi32>
    %c0_i32_114 = arith.constant 0 : i32
    %267 = vector.broadcast %c0_i32_114 : i32 to vector<1x128xi32>
    %268 = arith.cmpi eq, %266, %267 : vector<1x128xi32>
    %269 = arith.extui %268 : vector<1x128xi1> to vector<1x128xi32>
    %270 = arith.sitofp %269 : vector<1x128xi32> to vector<1x128xf32>
    %271 = vector.broadcast %44 : vector<1x1xf32> to vector<1x128xf32>
    %272 = arith.mulf %270, %271 : vector<1x128xf32>
    %c1_i32 = arith.constant 1 : i32
    %273 = vector.broadcast %c1_i32 : i32 to vector<1x128xi32>
    %274 = arith.cmpi eq, %266, %273 : vector<1x128xi32>
    %275 = arith.extui %274 : vector<1x128xi1> to vector<1x128xi32>
    %276 = arith.sitofp %275 : vector<1x128xi32> to vector<1x128xf32>
    %277 = vector.broadcast %77 : vector<1x1xf32> to vector<1x128xf32>
    %278 = arith.mulf %276, %277 : vector<1x128xf32>
    %279 = arith.addf %272, %278 : vector<1x128xf32>
    %c2_i32 = arith.constant 2 : i32
    %280 = vector.broadcast %c2_i32 : i32 to vector<1x128xi32>
    %281 = arith.cmpi eq, %266, %280 : vector<1x128xi32>
    %282 = arith.extui %281 : vector<1x128xi1> to vector<1x128xi32>
    %283 = arith.sitofp %282 : vector<1x128xi32> to vector<1x128xf32>
    %284 = vector.broadcast %171 : vector<1x1xf32> to vector<1x128xf32>
    %285 = arith.mulf %283, %284 : vector<1x128xf32>
    %286 = arith.addf %279, %285 : vector<1x128xf32>
    %c3_i32 = arith.constant 3 : i32
    %287 = vector.broadcast %c3_i32 : i32 to vector<1x128xi32>
    %288 = arith.cmpi eq, %266, %287 : vector<1x128xi32>
    %289 = arith.extui %288 : vector<1x128xi1> to vector<1x128xi32>
    %290 = arith.sitofp %289 : vector<1x128xi32> to vector<1x128xf32>
    %291 = vector.broadcast %254 : vector<1x1xf32> to vector<1x128xf32>
    %292 = arith.mulf %290, %291 : vector<1x128xf32>
    %293 = arith.addf %286, %292 : vector<1x128xf32>
    %c4_i32 = arith.constant 4 : i32
    %294 = vector.broadcast %c4_i32 : i32 to vector<1x128xi32>
    %295 = arith.cmpi eq, %266, %294 : vector<1x128xi32>
    %296 = arith.extui %295 : vector<1x128xi1> to vector<1x128xi32>
    %297 = arith.sitofp %296 : vector<1x128xi32> to vector<1x128xf32>
    %298 = vector.broadcast %265 : vector<1x1xf32> to vector<1x128xf32>
    %299 = arith.mulf %297, %298 : vector<1x128xf32>
    %300 = arith.addf %293, %299 : vector<1x128xf32>
    %c0_115 = arith.constant 0 : index
    %c0_116 = arith.constant 0 : index
    %301 = vector.load %arg22[%c0_115, %c0_116] : memref<1x128xf32, #tpu.memory_space<vmem>>, vector<1x128xf32>
    tpu.vector_store %arg22[%c0_115, %c0_116], %300 {strides = array<i32>} : memref<1x128xf32, #tpu.memory_space<vmem>>, vector<1x128xf32>,
    return
  }
  func.func @transform_0(%arg0: i32) -> (i32, i32) {
    %c0_i32 = arith.constant 0 : i32
    %c0_i32_0 = arith.constant 0 : i32
    %c0_i32_1 = arith.constant 0 : i32
    return %c0_i32, %c0_i32_0 : i32, i32
  }
  func.func @transform_1(%arg0: i32) -> (i32, i32) {
    %c0_i32 = arith.constant 0 : i32
    %c0_i32_0 = arith.constant 0 : i32
    %c0_i32_1 = arith.constant 0 : i32
    return %c0_i32, %c0_i32_0 : i32, i32
  }
  func.func @transform_2(%arg0: i32) -> (i32, i32) {
    %c0_i32 = arith.constant 0 : i32
    %c0_i32_0 = arith.constant 0 : i32
    %c0_i32_1 = arith.constant 0 : i32
    return %c0_i32, %c0_i32_0 : i32, i32
  }
  func.func @transform_3(%arg0: i32) -> (i32, i32) {
    %c0_i32 = arith.constant 0 : i32
    %c0_i32_0 = arith.constant 0 : i32
    %c0_i32_1 = arith.constant 0 : i32
    return %c0_i32, %c0_i32_0 : i32, i32
  }
  func.func @transform_4(%arg0: i32) -> (i32, i32) {
    %c0_i32 = arith.constant 0 : i32
    %c0_i32_0 = arith.constant 0 : i32
    %c0_i32_1 = arith.constant 0 : i32
    return %c0_i32, %c0_i32_0 : i32, i32
  }
  func.func @transform_5(%arg0: i32) -> (i32, i32) {
    %c0_i32 = arith.constant 0 : i32
    %c0_i32_0 = arith.constant 0 : i32
    %c0_i32_1 = arith.constant 0 : i32
    return %c0_i32, %c0_i32_0 : i32, i32
  }
  func.func @transform_6(%arg0: i32) -> (i32, i32) {
    %c0_i32 = arith.constant 0 : i32
    %c0_i32_0 = arith.constant 0 : i32
    %c0_i32_1 = arith.constant 0 : i32
    return %c0_i32, %c0_i32_0 : i32, i32
  }
  func.func @transform_7(%arg0: i32) -> (i32, i32) {
    %c0_i32 = arith.constant 0 : i32
    %c0_i32_0 = arith.constant 0 : i32
    %c0_i32_1 = arith.constant 0 : i32
    return %c0_i32, %c0_i32_0 : i32, i32
  }
  func.func @transform_8(%arg0: i32) -> (i32, i32) {
    %c0_i32 = arith.constant 0 : i32
    %c0_i32_0 = arith.constant 0 : i32
    %c0_i32_1 = arith.constant 0 : i32
    return %c0_i32, %c0_i32_0 : i32, i32
  }
  func.func @transform_9(%arg0: i32) -> (i32, i32) {
    %c0_i32 = arith.constant 0 : i32
    %c0_i32_0 = arith.constant 0 : i32
    %c0_i32_1 = arith.constant 0 : i32
    return %c0_i32, %c0_i32_0 : i32, i32
  }
  func.func @transform_10(%arg0: i32) -> (i32, i32) {
    %c0_i32 = arith.constant 0 : i32
    %c0_i32_0 = arith.constant 0 : i32
    %c0_i32_1 = arith.constant 0 : i32
    return %c0_i32, %c0_i32_0 : i32, i32
  }
  func.func @transform_11(%arg0: i32) -> (i32, i32) {
    %c0_i32 = arith.constant 0 : i32
    %c0_i32_0 = arith.constant 0 : i32
    %c0_i32_1 = arith.constant 0 : i32
    return %c0_i32, %c0_i32_0 : i32, i32
  }
  func.func @transform_12(%arg0: i32) -> (i32, i32) {
    %c0_i32 = arith.constant 0 : i32
    %c0_i32_0 = arith.constant 0 : i32
    %c0_i32_1 = arith.constant 0 : i32
    return %c0_i32, %c0_i32_0 : i32, i32
  }
  func.func @transform_13(%arg0: i32) -> (i32, i32) {
    %c0_i32 = arith.constant 0 : i32
    %c0_i32_0 = arith.constant 0 : i32
    %c0_i32_1 = arith.constant 0 : i32
    return %c0_i32, %c0_i32_0 : i32, i32
  }
  func.func @transform_14(%arg0: i32) -> (i32, i32) {
    %c0_i32 = arith.constant 0 : i32
    %c0_i32_0 = arith.constant 0 : i32
    %c0_i32_1 = arith.constant 0 : i32
    return %c0_i32, %c0_i32_0 : i32, i32
  }
  func.func @transform_15(%arg0: i32) -> (i32, i32) {
    %c0_i32 = arith.constant 0 : i32
    %c0_i32_0 = arith.constant 0 : i32
    %c0_i32_1 = arith.constant 0 : i32
    return %c0_i32, %c0_i32_0 : i32, i32
  }
  func.func @transform_16(%arg0: i32) -> (i32, i32) {
    %c0_i32 = arith.constant 0 : i32
    %c0_i32_0 = arith.constant 0 : i32
    %c0_i32_1 = arith.constant 0 : i32
    return %c0_i32, %c0_i32_0 : i32, i32
  }
  func.func @transform_17(%arg0: i32) -> (i32, i32) {
    %c0_i32 = arith.constant 0 : i32
    %c0_i32_0 = arith.constant 0 : i32
    %c0_i32_1 = arith.constant 0 : i32
    return %c0_i32, %c0_i32_0 : i32, i32
  }
  func.func @transform_18(%arg0: i32) -> (i32, i32) {
    %c0_i32 = arith.constant 0 : i32
    %c0_i32_0 = arith.constant 0 : i32
    %c0_i32_1 = arith.constant 0 : i32
    return %c0_i32, %c0_i32_0 : i32, i32
  }
  func.func @transform_19(%arg0: i32) -> (i32, i32) {
    %c0_i32 = arith.constant 0 : i32
    %c0_i32_0 = arith.constant 0 : i32
    %c0_i32_1 = arith.constant 0 : i32
    return %c0_i32, %c0_i32_0 : i32, i32
  }
  func.func @transform_20(%arg0: i32) -> (i32, i32) {
    %c0_i32 = arith.constant 0 : i32
    %c0_i32_0 = arith.constant 0 : i32
    %c0_i32_1 = arith.constant 0 : i32
    return %c0_i32, %c0_i32_0 : i32, i32
  }
  func.func @transform_21(%arg0: i32) -> (i32, i32) {
    %c0_i32 = arith.constant 0 : i32
    %c0_i32_0 = arith.constant 0 : i32
    %c0_i32_1 = arith.constant 0 : i32
    return %c0_i32, %c0_i32_0 : i32, i32
  }
}

</mosaic_0001>

<bundles_post_ra>
// kernel: _device_forward.1
= control target key start
LH: loop header
LB: loop body
LE: loop exit
PB: predicated region body
PF: predicated region fallthrough
CT: control target
= control target key end

     0   :  { %v85_v0 = vlaneseq  ;;  %v2011_v1 = vmov 0.0|0.0   ;;  %vm151_vm0 = vcmask 130048   ;;  %vm2012_vm3 = vmmov 0   ;;  %s2530_s4 = inlined_call_operand.vmem [shape: s32[1,128], index: 4, kind: input, shape index: {}]   ;;  %s2531_s7 = inlined_call_operand.vmem [shape: s32[4,128], index: 7, kind: input, shape index: {}]   ;;  %s2532_s5 = inlined_call_operand.vmem [shape: f32[32,16], index: 5, kind: input, shape index: {}]   ;;  %s2533_s10 = inlined_call_operand.vmem [shape: f32[32,1], index: 10, kind: input, shape index: {}]   ;;  %s2534_s2 = inlined_call_operand.vmem [shape: f32[2,16], index: 2, kind: input, shape index: {}]   ;;  %s2535_s12 = inlined_call_operand.vmem [shape: f32[32,1], index: 12, kind: input, shape index: {}]   ;;  %s2536_s6 = inlined_call_operand.vmem [shape: f32[32,2], index: 6, kind: input, shape index: {}]   ;;  %s2537_s16 = inlined_call_operand.vmem [shape: f32[32,1], index: 16, kind: input, shape index: {}]   ;;  %s2538_s18 = inlined_call_operand.vmem [shape: f32[32,1], index: 18, kind: input, shape index: {}]   ;;  %s2539_s20 = inlined_call_operand.vmem [shape: f32[2,1], index: 20, kind: input, shape index: {}]   ;;  %s2540_s14 = inlined_call_operand.vmem [shape: f32[2,1], index: 14, kind: input, shape index: {}]   ;;  %s2541_s0 = inlined_call_operand.vmem [shape: f32[2,128], index: 0, kind: input, shape index: {}]   ;;  %s2542_s1 = inlined_call_operand.vmem [shape: s32[1,128], index: 1, kind: input, shape index: {}]   ;;  %s2543_s9 = inlined_call_operand.vmem [shape: f32[32,96], index: 9, kind: input, shape index: {}]   ;;  %s2544_s3 = inlined_call_operand.vmem [shape: f32[2,128], index: 3, kind: input, shape index: {}]   ;;  %s2545_s11 = inlined_call_operand.vmem [shape: f32[32,32], index: 11, kind: input, shape index: {}]   ;;  %s2546_s8 = inlined_call_operand.vmem [shape: s32[3,128], index: 8, kind: input, shape index: {}]   ;;  %s2547_s13 = inlined_call_operand.vmem [shape: f32[2,32], index: 13, kind: input, shape index: {}]   ;;  %s2548_s15 = inlined_call_operand.vmem [shape: f32[32,64], index: 15, kind: input, shape index: {}]   ;;  %s2549_s17 = inlined_call_operand.vmem [shape: f32[32,32], index: 17, kind: input, shape index: {}]   ;;  %s2550_s19 = inlined_call_operand.vmem [shape: f32[2,32], index: 19, kind: input, shape index: {}]   ;;  %s2551_s21 = inlined_call_operand.vmem [shape: f32[1,128], index: 21, kind: output, shape index: {}]  }
   0x1   :  { %2555 = sst [smem:[#allocation2_spill]] %s2530_s4  ;;  %1894 = vmatprep.subr.bf16.mxu0 %v2011_v1  ;;  %v2013_v5 = vmov 0.0   ;;  %v2014_v18 = vmov 0   ;;  %v2015_v21 = vmov 1.0|1.0   ;;  %vm241_vm13 = vcmask 1041408  }
   0x2   :  { %2556 = sst [smem:[#allocation3_spill]] %s2531_s7  ;;  %s2561_s26 = sld [smem:[#allocation2_spill]]  ;;  %v2141_v4 = vshrl.u32 %v85_v0, 7  ;;  %1741 = vmatprep.mubr.msk.f32.mxu0 %vm2012_vm3, %v2013_v5  ;;  %1990 = vset.pattern.permute.xlu1 %v2014_v18  ;;  %v258_v30 = vld [vmem:[%s2536_s6] sm:$0xff]  ;;  %vm477_vm15 = vcmask 15360   ;;  %v259_v32 = vld [vmem:[%s2536_s6 + $0x8] sm:$0xff] }
   0x3   :  { %2557 = sst [smem:[#allocation4_spill]] %s2532_s5  ;;  %s2562_s28 = sld [smem:[#allocation3_spill]]  ;;  %1989 = vset.pattern.permute.xlu0 %v2014_v18  ;;  %v260_v34 = vld [vmem:[%s2536_s6 + $0x10] sm:$0xff]  ;;  %v1161_v35 = vld [vmem:[%s2537_s16 + $0x8] sm:$0xff]  ;;  %v261_v36 = vld [vmem:[%s2536_s6 + $0x18] sm:$0xff] }
   0x4   :  { %2558 = sst [smem:[#allocation5_spill]] %s2533_s10  ;;  %s2563_s4 = sld [smem:[#allocation4_spill]]  ;;  %v2159_v9 = vsub.s32 0, %v2141_v4  ;;  %v2162_v10 = vadd.s32 8, %v2141_v4  ;;  %v377_v11 = vsub.s32 1, %v2141_v4  ;;  %v472_v12 = vsub.s32 2, %v2141_v4 }
   0x5   :  { %2559 = sst [smem:[#allocation6_spill]] %s2534_s2  ;;  %s2564_s22 = sld [smem:[#allocation5_spill]]  ;;  %v1160_v37 = vld [vmem:[%s2537_s16] sm:$0xff]  ;;  %v1163_v38 = vld [vmem:[%s2537_s16 + $0x18] sm:$0xff]  ;;  %v1162_v39 = vld [vmem:[%s2537_s16 + $0x10] sm:$0xff] }
   0x6   :  { %2560 = sst [smem:[#allocation7_spill]] %s2535_s12  ;;  %s2565_s27 = sld [smem:[#allocation6_spill]]  ;;  %v1169_v40 = vld [vmem:[%s2538_s18 + $0x8] sm:$0xff]  ;;  %v1168_v41 = vld [vmem:[%s2538_s18] sm:$0xff]  ;;  %v1171_v42 = vld [vmem:[%s2538_s18 + $0x18] sm:$0xff] }
   0x7   :  { %s2566_s24 = sld [smem:[#allocation7_spill]]  ;;  %v1170_v43 = vld [vmem:[%s2538_s18 + $0x10] sm:$0xff]  ;;  %v1173_v44 = vld [vmem:[%s2539_s20] sm:$0x3]  ;;  %v2016_v58 = vmov 0.2  }
   0x8   :  { %v2133_v2 = vld [vmem:[%s2561_s26] sm:$0x1] }
   0x9   :  { %v2138_v3 = vld [vmem:[%s2562_s28] sm:$0xf]  ;;  %vm136_vm1 = vcmp.gt.s32.totalorder %v2133_v2, 0 }
   0xa   :  { %vm266_vm2 = vcmp.gt.s32.totalorder %v2138_v3, 0  ;;  %v2150_v6 = vld [vmem:[%s2563_s4] sm:$0xff]  ;;  %v137_v7 = vsel %vm136_vm1, %v2133_v2, 0  ;;  %v2199_v24 = vld [vmem:[%s2563_s4 + $0x8] sm:$0xff]  ;;  %v2209_v26 = vld [vmem:[%s2563_s4 + $0x10] sm:$0xff] }
   0xb   :  { %v2154_v8 = vsel %vm266_vm2, %v2138_v3, 0  ;;  %1748 = vmatprep.mubr.msk.f32.mxu1 %vm151_vm0, %v2150_v6  ;;  %v584_v13 = vld [vmem:[%s2564_s22 + $0x10] sm:$0xff]  ;;  %v144_v14 = vrot.slane %v137_v7, %v2159_v9  ;;  %v582_v19 = vld [vmem:[%s2564_s22] sm:$0xff]  ;;  %v585_v20 = vld [vmem:[%s2564_s22 + $0x18] sm:$0xff] }
   0xc   :  { %v271_v15 = vrot.slane %v2154_v8, %v2159_v9  ;;  %v378_v16 = vrot.slane %v2154_v8, %v377_v11  ;;  %v473_v17 = vrot.slane %v2154_v8, %v472_v12  ;;  %609 = vperm.xlu1 %1990, %v584_v13   ;;  %599 = vperm.xlu0 %1989, %v582_v19   ;;  %v135_v22 = vld [vmem:[%s2565_s27] sm:$0x3]  ;;  %v583_v25 = vld [vmem:[%s2564_s22 + $0x8] sm:$0xff]  ;;  %v2225_v28 = vld [vmem:[%s2563_s4 + $0x18] sm:$0xff]  ;;  %v2017_v13 = vmov 1966171168  }
   0xd   :  { %vm145_vm4 = vcmp.eq.s32.totalorder %v2141_v4, %v144_v14  ;;  %vm146_vm5 = vcmp.eq.s32.totalorder %v2162_v10, %v144_v14  ;;  %v591_v27 = vld [vmem:[%s2566_s24 + $0x8] sm:$0xff]  ;;  %v590_v29 = vld [vmem:[%s2566_s24] sm:$0xff]  ;;  %v593_v31 = vld [vmem:[%s2566_s24 + $0x18] sm:$0xff]  ;;  %v102_v14 = vunpack.c.l.s4 %v2017_v13 }
   0xe   :  { %vm272_vm6 = vcmp.eq.s32.totalorder %v2141_v4, %v271_v15  ;;  %vm273_vm7 = vcmp.eq.s32.totalorder %v2162_v10, %v271_v15  ;;  %vm1895_vm8 = vmpackc.low %vm146_vm5, %vm145_vm4  ;;  %vm379_vm9 = vcmp.eq.s32.totalorder %v2141_v4, %v378_v16  ;;  %vm380_vm10 = vcmp.eq.s32.totalorder %v2162_v10, %v378_v16  ;;  %v592_v33 = vld [vmem:[%s2566_s24 + $0x10] sm:$0xff]  ;;  %v595_v45 = vld [vmem:[%s2540_s14] sm:$0x3] }
   0xf   :  { %vm474_vm11 = vcmp.eq.s32.totalorder %v2141_v4, %v473_v17  ;;  %1896 = vmatpush3.bf16.msk.msra.mxu0 %vm1895_vm8, %v2015_v21  ;;  %vm1897_vm12 = vmpackc.low %vm273_vm7, %vm272_vm6  ;;  %v68_v46 = vld [vmem:[%s2541_s0] sm:$0x3]  ;;  %vm118_vm5 = vcmask 1040384   ;;  %vm132_vm6 = vcmp.ge.s32.totalorder %v2133_v2, 0  ;;  %v103_v19 = vunpack.c.0.s8 %v102_v14 }
  0x10   :  { %v1605_v23 = vsel %vm474_vm11, 1.0, %v2013_v5  ;;  %1898 = vmatprep.subr.msk.bf16.mxu1 %vm1897_vm12, %v2015_v21  ;;  %vm1901_vm14 = vmpackc.low %vm380_vm10, %vm379_vm9  ;;  %614 = vperm.xlu1 %1990, %v585_v20   ;;  %v70_v47 = vrot.slane %v68_v46, 7  ;;  %v73_v53 = vld [vmem:[%s2542_s1] sm:$0x1]  ;;  %v1582_v12 = vsel %vm132_vm6, 1.0, %v2013_v5  ;;  %vm617_vm7 = vcmask 785408  }
  0x11   :  { %1900 = vmatpush3.bf16.msk.msra.mxu1 %vm1897_vm12, %v2015_v21  ;;  %1902 = vmatprep.subr.msk.bf16.mxu0 %vm1901_vm14, %v2015_v21  ;;  %v1580_v55 = vcvt.s32.f32 %v73_v53  ;;  %vm77_vm1 = vcmp.gt.s32.totalorder %v73_v53, 0  ;;  %vm74_vm2 = vcmp.ge.s32.totalorder %v73_v53, 0  ;;  %v235_v17 = vsel %vm118_vm5, %v1582_v12, 0.0 }
  0x12   :  { %1742 = vmatmul.mubr.msk.f32.vlgmr.msra.gmra.mrb[0].mxu0 %vm151_vm0, %v135_v22  ;;  %1764 = vmatprep.subr.msk.mxu1 %vm241_vm13, %v1605_v23  ;;  %v72_v48 = vsub.f32 %v68_v46, %v70_v47  ;;  %v1579_v57 = vsel %vm74_vm2, 1.0, %v2013_v5  ;;  %v106_v22 = vsub.s32 %v103_v19, %v2141_v4  ;;  %vm263_vm8 = vcmp.ge.s32.totalorder %v2138_v3, 0 }
  0x13   :  { %1904 = vmatpush3.bf16.msk.msra.mxu0 %vm1901_vm14, %v2015_v21  ;;  %1758 = vmatprep.mubr.msk.f32.mxu0 %vm151_vm0, %v2150_v6  ;;  %v1581_v56 = vsel %vm77_vm1, %v1580_v55, 0.0  ;;  %vm947_vm10 = vcmask 1043459   ;;  %vm739_vm11 = vcmask 261120  }
  0x14   :  { %1749 = vmatmul.mubr.msk.f32.vlgmr.msra.gmra.mrb[0].mxu1 %vm151_vm0, %v2199_v24  ;;  %604 = vperm.xlu0 %1989, %v583_v25   ;;  %v92_v49 = vand.u32 2147483647, %v72_v48  ;;  %vm80_vm4 = vcmp.gt.f32.partialorder %v1581_v56, 0.5  ;;  %v88_v61 = vrot.slane %v1581_v56, %v2159_v9  ;;  %v83_v63 = vmax.f32 %v72_v48, 0.0 }
  0x15   :  { %1751 = vmatprep.mubr.msk.f32.mxu1 %vm151_vm0, %v2209_v26  ;;  %1765 = vmatpush3.msk.msra.mxu1 %vm241_vm13, %v1605_v23  ;;  %v81_v59 = vsel %vm80_vm4, 0.8, %v2016_v58 }
  0x16   :  { %1759 = vmatmul.mubr.msk.f32.vlgmr.msra.gmra.mrb[2].mxu0 %vm151_vm0, %v2199_v24  ;;  %726 = vperm.xlu1 %1990, %v591_v27   ;;  %v93_v50 = vsub.f32 0.0, %v92_v49  ;;  %v82_v60 = vmul.f32 %v1579_v57, %v81_v59  ;;  %v90_v7 = vmul.f32 %v88_v61, %v72_v48 }
  0x17   :  { %1761 = vmatprep.mubr.msk.f32.mxu0 %vm151_vm0, %v2209_v26 }
  0x18   :  { %1752 = vmatmul.mubr.msk.f32.gmra.mrb[2].mxu1 %vm151_vm0, %v2225_v28  ;;  %721 = vperm.xlu0 %1989, %v590_v29   ;;  %v94_v51 = vmul.f32 1.442695, %v93_v50  ;;  %v123_v62 = vsel %vm118_vm5, %v82_v60, 0.0  ;;  %v91_v16 = vsub.f32 %v83_v63, %v90_v7  ;;  %v578_v29 = vld [vmem:[%s2543_s9] sm:$0xff]  ;;  %v579_v63 = vld [vmem:[%s2543_s9 + $0x8] sm:$0xff]  ;;  %v580_v7 = vld [vmem:[%s2543_s9 + $0x10] sm:$0xff] }
  0x19   :  { %1766 = vmatprep.mubr.msk.f32.mxu1 %vm477_vm15, %v258_v30  ;;  %v596_v30 = vcvt.s32.f32 %v2154_v8  ;;  %v1157_v8 = vld [vmem:[%s2548_s15 + $0x8] sm:$0xff] }
  0x1a   :  { %1762 = vmatmul.mubr.msk.f32.gmra.mrb[4].mxu0 %vm151_vm0, %v2225_v28  ;;  %736 = vperm.xlu1 %1990, %v593_v31   ;;  %1991 = vpow2.f32 %v94_v51  ;;  %v225_v31 = vld [vmem:[%s2544_s3] sm:$0x3] }
  0x1b   :  { %1796 = vmatprep.mubr.msk.f32.mxu0 %vm617_vm7, %v578_v29  ;;  %vm937_vm9 = vcmp.gt.f32.partialorder %v596_v30, 0.5 }
  0x1c   :  { %1767 = vmatmul.mubr.msk.f32.vlgmr.msra.gmra.mrb[4].mxu1 %vm477_vm15, %v259_v32  ;;  %731 = vperm.xlu0 %1989, %v592_v33   ;;  %v1588_v32 = vsel %vm263_vm8, 1.0, %v2013_v5 }
  0x1d   :  { %1769 = vmatprep.mubr.msk.f32.mxu1 %vm477_vm15, %v260_v34 }
  0x1e   :  { %1182 = vperm.xlu1 %1990, %v1161_v35  }
  0x20   :  { %1770 = vmatmul.mubr.msk.f32.gmra.mrb[6].mxu1 %vm477_vm15, %v261_v36  ;;  %1177 = vperm.xlu0 %1989, %v1160_v37   ;;  %v232_v36 = vrot.slane %v1582_v12, %v2159_v9  ;;  %v940_v37 = vrot.slane %v1588_v32, 5  ;;  %v581_v12 = vld [vmem:[%s2543_s9 + $0x18] sm:$0xff]  ;;  %v586_v32 = vld [vmem:[%s2545_s11] sm:$0xff] }
  0x21   :  { %1810 = vmatprep.mubr.msk.f32.mxu1 %vm739_vm11, %v586_v32 }
  0x22   :  { %1192 = vperm.xlu1 %1990, %v1163_v38  }
  0x24   :  { %1187 = vperm.xlu0 %1989, %v1162_v39   ;;  %v1992_v52 = vpop.eup %1991  ;;  %v2018_v39 = vmov 1.0  }
  0x25   :  { %v96_v54 = vadd.f32 1.0, %v1992_v52  ;;  %v938_v3 = vsel %vm937_vm9, 20.0, %v2018_v39 }
  0x26   :  { %1304 = vperm.xlu1 %1990, %v1169_v40   ;;  %v2317_v46 = vmul.f32 %v940_v37, %v938_v3 }
  0x27   :  { %1993 = vlog2.f32 %v96_v54 }
  0x28   :  { %1299 = vperm.xlu0 %1989, %v1168_v41   ;;  %v952_v54 = vsel %vm947_vm10, %v2317_v46, 0.0 }
  0x2a   :  { %1314 = vperm.xlu1 %1990, %v1171_v42  }
  0x2c   :  { %1309 = vperm.xlu0 %1989, %v1170_v43  }
  0x2e   :  { %1420 = vperm.xlu1 %1990, %v1173_v44  }
  0x30   :  { %843 = vperm.xlu0 %1989, %v595_v45  }
  0x31   :  { %v1994_v15 = vpop.eup %1993 }
  0x32   :  { %v98_v18 = vmul.f32 0.6931472, %v1994_v15 }
  0x34   :  { %v99_v20 = vadd.f32 %v98_v18, %v91_v16 }
  0x36   :  { %v107_v23 = vrot.slane %v99_v20, %v106_v22 }
  0x38   :  { %v108_v25 = vcombine.high %v107_v23, %v107_v23 }
  0x3a   :  { %v115_v27 = vrot.slane %v108_v25, %v106_v22 }
  0x3c   :  { %v117_v2 = vmul.f32 %v115_v27, %v82_v60 }
  0x3e   :  { %v119_v59 = vsel %vm118_vm5, %v117_v2, 0.0 }
  0x4f   :  { %124 = vadd.xlane.f32.xlu0 %v123_v62 }
  0x52   :  { %236 = vadd.xlane.f32.xlu1 %v235_v17 }
  0x8b   :  { %v600_v13 = vpop.permute.xlu0 %599  ;;  %v610_v14 = vpop.permute.xlu1 %609 }
  0x8f   :  { %v615_v16 = vpop.permute.xlu1 %614 }
  0x93   :  { %v605_v15 = vpop.permute.xlu0 %604 }
  0x95   :  { %v2339_v18 = vpop.permute.xlu1 %726 }
  0x97   :  { %v2337_v17 = vpop.permute.xlu0 %721 }
  0x99   :  { %v2343_v20 = vpop.permute.xlu1 %736 }
  0x9b   :  { %v2341_v19 = vpop.permute.xlu0 %731 }
  0x9d   :  { %v2347_v23 = vpop.permute.xlu1 %1182 }
  0x9f   :  { %v2345_v22 = vpop.permute.xlu0 %1177 }
  0xa1   :  { %v2351_v27 = vpop.permute.xlu1 %1192 }
  0xa3   :  { %v2349_v25 = vpop.permute.xlu0 %1187 }
  0xa5   :  { %v2355_v29 = vpop.permute.xlu1 %1304 }
  0xa7   :  { %v2353_v2 = vpop.permute.xlu0 %1299 }
  0xe5   :  { %v221_v33 = vpop.f32.mrb[0].mxu0 }
  0xe6   :  { %v226_v34 = vsub.f32 %v221_v33, %v225_v31  ;;  %v1743_v35 = vpop.f32.mrb[1].mxu0  ;;  %v2357_v31 = vpop.permute.xlu0 %1309 }
  0xe7   :  { %v1750_v38 = vpop.f32.mrb[0].mxu1  ;;  %v2363_v33 = vpop.permute.xlu1 %1314 }
  0xe8   :  { %v227_v40 = vand.u32 2147483647, %v226_v34  ;;  %v356_v41 = vpop.f32.mrb[1].mxu1 }
  0xe9   :  { %v1905_v42 = vpack.c.bf16 %v1750_v38, %v356_v41  ;;  %v1760_v43 = vpop.f32.mrb[2].mxu0 }
  0xea   :  { %v234_v44 = vmul.f32 %v232_v36, %v227_v40  ;;  %v451_v45 = vpop.f32.mrb[3].mxu0  ;;  %v2365_v34 = vpop.permute.xlu0 %843 }
  0xeb   :  { %v1753_v47 = vpop.f32.mrb[2].mxu1  ;;  %1906 = vmatprep.subr.bf16.mxu0 %v1905_v42  ;;  %v1913_v48 = vpack.c.bf16 %v1760_v43, %v451_v45  ;;  %v2367_v35 = vpop.permute.xlu1 %1420 }
  0xec   :  { %v366_v49 = vpop.f32.mrb[3].mxu1  ;;  %1908 = vmatpush3.bf16.msra.mxu0 %v1905_v42  ;;  %v242_v50 = vsel %vm241_vm13, %v234_v44, 0.0  ;;  %v2373_v44 = vand.u32 127, %v85_v0 }
  0xed   :  { %v1909_v51 = vpack.c.bf16 %v1753_v47, %v366_v49  ;;  %243 = vadd.xlane.f32.xlu0 %v242_v50  ;;  %v1763_v52 = vpop.f32.mrb[4].mxu0 }
  0xee   :  { %v461_v53 = vpop.f32.mrb[5].mxu0  ;;  %v125_v36 = vpop.xlane.xlu0 %124  ;;  %vm1542_vm15 = vcmp.eq.s32.totalorder %v2373_v44, 0  ;;  %vm1546_vm1 = vcmp.eq.s32.totalorder %v2373_v44, 1 }
  0xef   :  { %1910 = vmatprep.subr.bf16.mxu0 %v1909_v51  ;;  %v1917_v55 = vpack.c.bf16 %v1763_v52, %v461_v53  ;;  %v1768_v56 = vpop.f32.mrb[4].mxu1  ;;  %vm127_vm12 = vcmp.gt.f32.partialorder %v125_v36, 0.0  ;;  %v237_v37 = vpop.xlane.xlu1 %236  ;;  %v1646_v53 = vsel %vm1542_vm15, 1.0, %v2013_v5  ;;  %vm1551_vm15 = vcmp.eq.s32.totalorder %v2373_v44, 2 }
  0xf0   :  { %1912 = vmatpush3.bf16.msra.mxu0 %v1909_v51  ;;  %v559_v57 = vpop.f32.mrb[5].mxu1  ;;  %v128_v38 = vsel %vm127_vm12, %v125_v36, 1.0  ;;  %vm239_vm14 = vcmp.gt.f32.partialorder %v237_v37, 0.0  ;;  %vm1195_vm12 = vcmask 523264  }
  0xf1   :  { %1914 = vmatprep.subr.bf16.mxu0 %v1913_v48  ;;  %v1921_v58 = vpack.c.bf16 %v1768_v56, %v559_v57  ;;  %953 = vadd.xlane.f32.xlu0 %v952_v54  ;;  %1995 = vrcp.f32 %v128_v38  ;;  %v240_v39 = vsel %vm239_vm14, %v237_v37, 1.0 }
  0xf2   :  { %1997 = vrcp.f32 %v240_v39 }
  0xf3   :  { %v1771_v60 = vpop.f32.mrb[6].mxu1 }
  0xf4   :  { %1916 = vmatpush3.bf16.msra.mxu0 %v1913_v48  ;;  %v569_v61 = vpop.f32.mrb[7].mxu1 }
  0xf5   :  { %1918 = vmatprep.subr.bf16.mxu0 %v1917_v55  ;;  %v1925_v62 = vpack.c.bf16 %v1771_v60, %v569_v61  ;;  %120 = vadd.xlane.f32.xlu0 %v119_v59 }
  0xf8   :  { %1920 = vmatpush3.bf16.msra.mxu0 %v1917_v55  ;;  %v1647_v55 = vsel %vm1546_vm1, 1.0, %v2013_v5 }
  0xf9   :  { %1922 = vmatprep.subr.bf16.mxu0 %v1921_v58 }
  0xfb   :  { %v1996_v47 = vpop.eup %1995 }
  0xfc   :  { %1924 = vmatpush3.bf16.msra.mxu0 %v1921_v58  ;;  %v1998_v52 = vpop.eup %1997 }
  0xfd   :  { %1926 = vmatprep.subr.bf16.mxu0 %v1925_v62 }
 0x100   :  { %1928 = vmatpush3.bf16.msra.mxu0 %v1925_v62 }
 0x103   :  { %1797 = vmatmul.mubr.msk.f32.vlgmr.msra.gmra.mrb[6].mxu0 %vm617_vm7, %v579_v63 }
 0x104   :  { %1799 = vmatprep.mubr.msk.f32.mxu0 %vm617_vm7, %v580_v7 }
 0x107   :  { %1800 = vmatmul.mubr.msk.f32.gmra.mrb[8].mxu0 %vm617_vm7, %v581_v12 }
 0x108   :  { %1841 = vmatprep.mubr.msk.f32.mxu0 %vm151_vm0, %v2150_v6 }
 0x17a   :  { %v244_v3 = vpop.xlane.xlu0 %243 }
 0x17b   :  { %v245_v40 = vsel %vm241_vm13, %v244_v3, 0.0 }
 0x17c   :  { %v246_v41 = vrot.slane %v245_v40, 4 }
 0x17e   :  { %v247_v42 = vadd.f32 %v246_v41, %v245_v40  ;;  %v2370_v43 = vpop.xlane.xlu0 %953 }
 0x180   :  { %v248_v45 = vrot.slane %v247_v42, 2 }
 0x182   :  { %v249_v48 = vadd.f32 %v248_v45, %v247_v42  ;;  %v121_v49 = vpop.xlane.xlu0 %120 }
 0x183   :  { %v2377_v51 = vmul.f32 %v1996_v47, %v121_v49 }
 0x184   :  { %v250_v50 = vrot.slane %v249_v48, 1 }
 0x185   :  { %v1545_v0 = vmul.f32 %v1646_v53, %v2377_v51 }
 0x186   :  { %v251_v54 = vadd.f32 %v250_v50, %v249_v48 }
 0x188   :  { %v2381_v56 = vmul.f32 %v1998_v52, %v251_v54 }
 0x18a   :  { %v1549_v57 = vmul.f32 %v1647_v55, %v2381_v56 }
 0x18c   :  { %v2385_v58 = vadd.f32 %v1549_v57, %v1545_v0 }
 0x1d6   :  { %v1798_v59 = vpop.f32.mrb[6].mxu0 }
 0x1d7   :  { %v702_v60 = vadd.f32 %v1798_v59, %v605_v15  ;;  %v696_v61 = vpop.f32.mrb[7].mxu0  ;;  %v587_v15 = vld [vmem:[%s2545_s11 + $0x8] sm:$0xff] }
 0x1d8   :  { %v697_v62 = vadd.f32 %v696_v61, %v600_v13  ;;  %v588_v13 = vld [vmem:[%s2545_s11 + $0x10] sm:$0xff] }
 0x1d9   :  { %v716_v63 = vmax.f32 %v702_v60, 0.0 }
 0x1da   :  { %v715_v7 = vmax.f32 %v697_v62, 0.0  ;;  %v1801_v12 = vpop.f32.mrb[8].mxu0 }
 0x1db   :  { %v712_v32 = vadd.f32 %v1801_v12, %v615_v16  ;;  %v706_v36 = vpop.f32.mrb[9].mxu0  ;;  %v960_v16 = vld [vmem:[%s2546_s8] sm:$0x7] }
 0x1dc   :  { %v1929_v37 = vpack.c.bf16 %v716_v63, %v715_v7  ;;  %v707_v38 = vadd.f32 %v706_v36, %v610_v14  ;;  %v589_v14 = vld [vmem:[%s2545_s11 + $0x18] sm:$0xff]  ;;  %vm964_vm13 = vcmp.gt.s32.totalorder %v960_v16, 0  ;;  %vm961_vm14 = vcmp.ge.s32.totalorder %v960_v16, 0 }
 0x1dd   :  { %v718_v39 = vmax.f32 %v712_v32, 0.0  ;;  %v2405_v41 = vsel %vm964_vm13, %v960_v16, 0  ;;  %v925_v63 = vrot.slane %v596_v30, 2  ;;  %v1158_v30 = vld [vmem:[%s2548_s15 + $0x10] sm:$0xff] }
 0x1de   :  { %v717_v3 = vmax.f32 %v707_v38, 0.0  ;;  %1930 = vmatprep.subr.bf16.mxu1 %v1929_v37  ;;  %v1064_v42 = vrot.slane %v2405_v41, %v377_v11  ;;  %v969_v50 = vrot.slane %v2405_v41, %v2159_v9  ;;  %v594_v9 = vld [vmem:[%s2547_s13] sm:$0x3] }
 0x1df   :  { %1932 = vmatpush3.bf16.msra.mxu1 %v1929_v37 }
 0x1e0   :  { %v1933_v40 = vpack.c.bf16 %v718_v39, %v717_v3  ;;  %vm1065_vm2 = vcmp.eq.s32.totalorder %v2141_v4, %v1064_v42  ;;  %vm1066_vm4 = vcmp.eq.s32.totalorder %v2162_v10, %v1064_v42  ;;  %vm970_vm7 = vcmp.eq.s32.totalorder %v2141_v4, %v969_v50 }
 0x1e1   :  { %vm1947_vm6 = vmpackc.low %vm1066_vm4, %vm1065_vm2  ;;  %vm971_vm8 = vcmp.eq.s32.totalorder %v2162_v10, %v969_v50 }
 0x1e2   :  { %1934 = vmatprep.subr.bf16.mxu1 %v1933_v40  ;;  %1948 = vmatprep.subr.msk.bf16.mxu0 %vm1947_vm6, %v2015_v21  ;;  %vm1943_vm9 = vmpackc.low %vm971_vm8, %vm970_vm7 }
 0x1e3   :  { %1936 = vmatpush3.bf16.msra.mxu1 %v1933_v40  ;;  %1950 = vmatpush3.bf16.msk.msra.mxu0 %vm1947_vm6, %v2015_v21 }
 0x1e4   :  { %1937 = vmatprep.subr.bf16.mxu1 %v2011_v1 }
 0x1e6   :  { %1811 = vmatmul.mubr.msk.f32.vlgmr.msra.gmra.mrb[8].mxu1 %vm739_vm11, %v587_v15  ;;  %1842 = vmatmul.mubr.msk.f32.vlgmr.msra.gmra.mrb[10].mxu0 %vm151_vm0, %v2199_v24 }
 0x1e7   :  { %1813 = vmatprep.mubr.msk.f32.mxu1 %vm739_vm11, %v588_v13  ;;  %1844 = vmatprep.mubr.msk.f32.mxu0 %vm151_vm0, %v2209_v26 }
 0x1ea   :  { %1814 = vmatmul.mubr.msk.f32.gmra.mrb[10].mxu1 %vm739_vm11, %v589_v14  ;;  %1845 = vmatmul.mubr.msk.f32.gmra.mrb[12].mxu0 %vm151_vm0, %v2225_v28 }
 0x1eb   :  { %1824 = vmatprep.mubr.msk.f32.mxu1 %vm2012_vm3, %v2013_v5 }
 0x2b9   :  { %v1812_v45 = vpop.f32.mrb[8].mxu1  ;;  %v1843_v4 = vpop.f32.mrb[10].mxu0 }
 0x2ba   :  { %v824_v11 = vadd.f32 %v1812_v45, %v2339_v18  ;;  %v818_v47 = vpop.f32.mrb[9].mxu1  ;;  %v1137_v10 = vpop.f32.mrb[11].mxu0 }
 0x2bb   :  { %v819_v48 = vadd.f32 %v818_v47, %v2337_v17 }
 0x2bc   :  { %v838_v49 = vmax.f32 %v824_v11, 0.0  ;;  %v1159_v11 = vld [vmem:[%s2548_s15 + $0x18] sm:$0xff] }
 0x2bd   :  { %v837_v52 = vmax.f32 %v819_v48, 0.0  ;;  %v1815_v53 = vpop.f32.mrb[10].mxu1 }
 0x2be   :  { %v834_v54 = vadd.f32 %v1815_v53, %v2343_v20  ;;  %v828_v55 = vpop.f32.mrb[11].mxu1  ;;  %v1846_v20 = vpop.f32.mrb[12].mxu0 }
 0x2bf   :  { %v1938_v0 = vpack.c.bf16 %v838_v49, %v837_v52  ;;  %v829_v57 = vadd.f32 %v828_v55, %v2341_v19  ;;  %v1959_v19 = vpack.c.bf16 %v1843_v4, %v1137_v10  ;;  %v1147_v60 = vpop.f32.mrb[13].mxu0 }
 0x2c0   :  { %v840_v59 = vmax.f32 %v834_v54, 0.0  ;;  %v1963_v61 = vpack.c.bf16 %v1846_v20, %v1147_v60  ;;  %v1164_v54 = vld [vmem:[%s2549_s17] sm:$0xff] }
 0x2c1   :  { %v839_v18 = vmax.f32 %v829_v57, 0.0  ;;  %1939 = vmatpush3.bf16.msra.mxu1 %v1938_v0  ;;  %1877 = vmatprep.mubr.msk.f32.mxu0 %vm739_vm11, %v1164_v54 }
 0x2c2   :  { %1940 = vmatprep.subr.bf16.mxu1 %v2011_v1 }
 0x2c3   :  { %v1941_v17 = vpack.c.bf16 %v840_v59, %v839_v18 }
 0x2c5   :  { %1942 = vmatpush3.bf16.msra.mxu1 %v1941_v17 }
 0x2c6   :  { %1944 = vmatprep.subr.msk.bf16.mxu1 %vm1943_vm9, %v2015_v21 }
 0x2c8   :  { %1825 = vmatmul.mubr.msk.f32.vlgmr.msra.gmra.mrb[12].mxu1 %vm739_vm11, %v594_v9 }
 0x2c9   :  { %1946 = vmatpush3.bf16.msk.msra.mxu1 %vm1943_vm9, %v2015_v21  ;;  %1831 = vmatprep.mubr.msk.f32.mxu1 %vm151_vm0, %v2150_v6  ;;  %v1156_v6 = vld [vmem:[%s2548_s15] sm:$0xff]  ;;  %v2448_v21 = vsel %vm961_vm14, 1.0, %v2013_v5 }
 0x2cc   :  { %1832 = vmatmul.mubr.msk.f32.vlgmr.msra.gmra.mrb[14].mxu1 %vm151_vm0, %v2199_v24  ;;  %v1522_v24 = vsel %vm118_vm5, %v2448_v21, 0.0 }
 0x2cd   :  { %1834 = vmatprep.mubr.msk.f32.mxu1 %vm151_vm0, %v2209_v26  ;;  %1523 = vadd.xlane.f32.xlu1 %v1522_v24 }
 0x2d0   :  { %1835 = vmatmul.mubr.msk.f32.gmra.mrb[16].mxu1 %vm151_vm0, %v2225_v28  ;;  %vm956_vm0 = vcmp.gt.f32.partialorder %v2370_v43, 0.0 }
 0x2d1   :  { %1863 = vmatprep.mubr.msk.f32.mxu1 %vm1195_vm12, %v1156_v6  ;;  %v957_v55 = vsel %vm956_vm0, %v2370_v43, 1.0 }
 0x35a   :  { %v2475_v0 = vpop.xlane.xlu1 %1523 }
 0x39b   :  { %v915_v26 = vpop.f32.mrb[12].mxu1 }
 0x39c   :  { %v916_v28 = vadd.f32 %v915_v26, %v2365_v34  ;;  %v1826_v62 = vpop.f32.mrb[13].mxu1 }
 0x39e   :  { %v920_v7 = vrot.slane %v916_v28, 7 }
 0x39f   :  { %v1833_v12 = vpop.f32.mrb[14].mxu1 }
 0x3a0   :  { %v922_v32 = vsub.f32 %v916_v28, %v920_v7  ;;  %v1042_v36 = vpop.f32.mrb[15].mxu1 }
 0x3a1   :  { %v1951_v37 = vpack.c.bf16 %v1833_v12, %v1042_v36 }
 0x3a2   :  { %v923_v38 = vmax.f32 %v922_v32, 0.0  ;;  %v927_v39 = vmul.f32 %v925_v63, %v922_v32  ;;  %v929_v3 = vand.u32 2147483647, %v922_v32 }
 0x3a3   :  { %v1836_v40 = vpop.f32.mrb[16].mxu1  ;;  %1952 = vmatprep.subr.bf16.mxu1 %v1951_v37 }
 0x3a4   :  { %v930_v15 = vsub.f32 0.0, %v929_v3  ;;  %v1052_v13 = vpop.f32.mrb[17].mxu1  ;;  %1954 = vmatpush3.bf16.msra.mxu1 %v1951_v37  ;;  %v928_v14 = vsub.f32 %v923_v38, %v927_v39 }
 0x3a5   :  { %v1955_v16 = vpack.c.bf16 %v1836_v40, %v1052_v13 }
 0x3a6   :  { %v931_v34 = vmul.f32 1.442695, %v930_v15 }
 0x3a7   :  { %1956 = vmatprep.subr.bf16.mxu1 %v1955_v16 }
 0x3a8   :  { %1999 = vpow2.f32 %v931_v34  ;;  %1958 = vmatpush3.bf16.msra.mxu1 %v1955_v16 }
 0x3a9   :  { %1960 = vmatprep.subr.bf16.mxu1 %v1959_v19 }
 0x3ac   :  { %1962 = vmatpush3.bf16.msra.mxu1 %v1959_v19 }
 0x3ad   :  { %1964 = vmatprep.subr.bf16.mxu1 %v1963_v61 }
 0x3b0   :  { %1966 = vmatpush3.bf16.msra.mxu1 %v1963_v61 }
 0x3b2   :  { %v2000_v42 = vpop.eup %1999 }
 0x3b3   :  { %1864 = vmatmul.mubr.msk.f32.vlgmr.msra.gmra.mrb[18].mxu1 %vm1195_vm12, %v1157_v8  ;;  %v933_v45 = vadd.f32 1.0, %v2000_v42 }
 0x3b4   :  { %1866 = vmatprep.mubr.msk.f32.mxu1 %vm1195_vm12, %v1158_v30 }
 0x3b5   :  { %2001 = vlog2.f32 %v933_v45 }
 0x3b6   :  { %2003 = vrcp.f32 %v957_v55 }
 0x3b7   :  { %1867 = vmatmul.mubr.msk.f32.gmra.mrb[20].mxu1 %vm1195_vm12, %v1159_v11 }
 0x3bf   :  { %v2002_v47 = vpop.eup %2001 }
 0x3c0   :  { %v935_v48 = vmul.f32 0.6931472, %v2002_v47  ;;  %v2004_v57 = vpop.eup %2003 }
 0x3c2   :  { %v936_v49 = vadd.f32 %v935_v48, %v928_v14  ;;  %v1174_v48 = vcvt.s32.f32 %v2405_v41 }
 0x3c4   :  { %v944_v50 = vrot.slane %v936_v49, 6  ;;  %v1502_v49 = vrot.slane %v1174_v48, 1 }
 0x3c6   :  { %v946_v52 = vmul.f32 %v944_v50, %v2317_v46  ;;  %v1648_v46 = vsel %vm1551_vm15, 1.0, %v2013_v5 }
 0x3c8   :  { %v948_v53 = vsel %vm947_vm10, %v946_v52, 0.0  ;;  %vm1559_vm10 = vcmp.eq.s32.totalorder %v2373_v44, 3 }
 0x3c9   :  { %949 = vadd.xlane.f32.xlu1 %v948_v53 }
 0x456   :  { %v950_v59 = vpop.xlane.xlu1 %949 }
 0x457   :  { %v2479_v18 = vmul.f32 %v2004_v57, %v950_v59 }
 0x459   :  { %v1554_v17 = vmul.f32 %v1648_v46, %v2479_v18  ;;  %v1533_v41 = vmul.f32 4.0, %v2479_v18 }
 0x45b   :  { %v1556_v9 = vrot.slane %v1554_v17, 3 }
 0x45d   :  { %v2483_v4 = vadd.f32 %v1556_v9, %v2385_v58  ;;  %v1531_v9 = vmul.f32 5.0, %v2381_v56 }
 0x486   :  { %v1865_v10 = vpop.f32.mrb[18].mxu1 }
 0x487   :  { %v1280_v43 = vadd.f32 %v1865_v10, %v2347_v23  ;;  %v1274_v19 = vpop.f32.mrb[19].mxu1  ;;  %v1166_v23 = vld [vmem:[%s2549_s17 + $0x10] sm:$0xff]  ;;  %v1530_v10 = vmul.f32 3.0, %v2377_v51 }
 0x488   :  { %v1275_v20 = vadd.f32 %v1274_v19, %v2345_v22  ;;  %v1165_v22 = vld [vmem:[%s2549_s17 + $0x8] sm:$0xff]  ;;  %v1535_v19 = vrot.slane %v1533_v41, 3 }
 0x489   :  { %v1294_v60 = vmax.f32 %v1280_v43, 0.0 }
 0x48a   :  { %v1293_v61 = vmax.f32 %v1275_v20, 0.0  ;;  %v1868_v6 = vpop.f32.mrb[20].mxu1 }
 0x48b   :  { %v1290_v24 = vadd.f32 %v1868_v6, %v2351_v27  ;;  %v1284_v26 = vpop.f32.mrb[21].mxu1 }
 0x48c   :  { %v1967_v28 = vpack.c.bf16 %v1294_v60, %v1293_v61  ;;  %v1285_v62 = vadd.f32 %v1284_v26, %v2349_v25  ;;  %v1167_v25 = vld [vmem:[%s2549_s17 + $0x18] sm:$0xff]  ;;  %v1532_v60 = vadd.f32 %v1531_v9, %v1530_v10 }
 0x48d   :  { %v1296_v63 = vmax.f32 %v1290_v24, 0.0 }
 0x48e   :  { %v1295_v7 = vmax.f32 %v1285_v62, 0.0  ;;  %1968 = vmatprep.subr.bf16.mxu0 %v1967_v28  ;;  %v1537_v6 = vadd.f32 %v1535_v19, %v1532_v60 }
 0x48f   :  { %1970 = vmatpush3.bf16.msra.mxu0 %v1967_v28 }
 0x490   :  { %v1971_v58 = vpack.c.bf16 %v1296_v63, %v1295_v7 }
 0x492   :  { %1972 = vmatprep.subr.bf16.mxu0 %v1971_v58 }
 0x493   :  { %1974 = vmatpush3.bf16.msra.mxu0 %v1971_v58 }
 0x494   :  { %1975 = vmatprep.subr.bf16.mxu0 %v2011_v1 }
 0x496   :  { %1878 = vmatmul.mubr.msk.f32.vlgmr.msra.gmra.mrb[14].mxu0 %vm739_vm11, %v1165_v22 }
 0x497   :  { %1880 = vmatprep.mubr.msk.f32.mxu0 %vm739_vm11, %v1166_v23 }
 0x49a   :  { %1881 = vmatmul.mubr.msk.f32.gmra.mrb[16].mxu0 %vm739_vm11, %v1167_v25 }
 0x49b   :  { %1891 = vmatprep.mubr.msk.f32.mxu0 %vm2012_vm3, %v2013_v5  ;;  %vm1526_vm3 = vcmp.gt.f32.partialorder %v2475_v0, 0.0 }
 0x49c   :  { %v1527_v17 = vsel %vm1526_vm3, %v2475_v0, 1.0 }
 0x569   :  { %v1879_v27 = vpop.f32.mrb[14].mxu0 }
 0x56a   :  { %v1401_v12 = vadd.f32 %v1879_v27, %v2355_v29  ;;  %v1395_v32 = vpop.f32.mrb[15].mxu0 }
 0x56b   :  { %v1396_v36 = vadd.f32 %v1395_v32, %v2353_v2  ;;  %v1172_v2 = vld [vmem:[%s2550_s19] sm:$0x3] }
 0x56c   :  { %v1415_v37 = vmax.f32 %v1401_v12, 0.0 }
 0x56d   :  { %v1414_v38 = vmax.f32 %v1396_v36, 0.0  ;;  %v1882_v39 = vpop.f32.mrb[16].mxu0 }
 0x56e   :  { %v1411_v3 = vadd.f32 %v1882_v39, %v2363_v33  ;;  %v1405_v40 = vpop.f32.mrb[17].mxu0 }
 0x56f   :  { %v1976_v15 = vpack.c.bf16 %v1415_v37, %v1414_v38  ;;  %v1406_v13 = vadd.f32 %v1405_v40, %v2357_v31 }
 0x570   :  { %v1417_v14 = vmax.f32 %v1411_v3, 0.0 }
 0x571   :  { %v1416_v16 = vmax.f32 %v1406_v13, 0.0  ;;  %1977 = vmatpush3.bf16.msra.mxu0 %v1976_v15 }
 0x572   :  { %1978 = vmatprep.subr.bf16.mxu0 %v2011_v1 }
 0x573   :  { %v1979_v34 = vpack.c.bf16 %v1417_v14, %v1416_v16 }
 0x575   :  { %1980 = vmatpush3.bf16.msra.mxu0 %v1979_v34 }
 0x578   :  { %1892 = vmatmul.mubr.msk.f32.vlgmr.msra.gmra.mrb[18].mxu0 %vm739_vm11, %v1172_v2 }
 0x64b   :  { %v1492_v29 = vpop.f32.mrb[18].mxu0 }
 0x64c   :  { %v1493_v33 = vadd.f32 %v1492_v29, %v2367_v35  ;;  %v1893_v8 = vpop.f32.mrb[19].mxu0 }
 0x64e   :  { %v1497_v30 = vrot.slane %v1493_v33, 7 }
 0x650   :  { %v1499_v42 = vsub.f32 %v1493_v33, %v1497_v30 }
 0x652   :  { %v1506_v31 = vand.u32 2147483647, %v1499_v42  ;;  %v1500_v50 = vmax.f32 %v1499_v42, 0.0  ;;  %v1504_v52 = vmul.f32 %v1502_v49, %v1499_v42 }
 0x654   :  { %v1507_v45 = vsub.f32 0.0, %v1506_v31  ;;  %v1505_v54 = vsub.f32 %v1500_v50, %v1504_v52 }
 0x656   :  { %v1508_v11 = vmul.f32 1.442695, %v1507_v45 }
 0x658   :  { %2005 = vpow2.f32 %v1508_v11 }
 0x662   :  { %v2006_v47 = vpop.eup %2005 }
 0x663   :  { %v1510_v1 = vadd.f32 1.0, %v2006_v47 }
 0x665   :  { %2007 = vlog2.f32 %v1510_v1 }
 0x666   :  { %2009 = vrcp.f32 %v1527_v17 }
 0x66f   :  { %v2008_v53 = vpop.eup %2007 }
 0x670   :  { %v1512_v55 = vmul.f32 0.6931472, %v2008_v53  ;;  %v2010_v43 = vpop.eup %2009 }
 0x672   :  { %v1513_v57 = vadd.f32 %v1512_v55, %v1505_v54 }
 0x674   :  { %v1515_v35 = vrot.slane %v1513_v57, 1 }
 0x676   :  { %v1517_v46 = vmul.f32 %v2448_v21, %v1515_v35  ;;  %v1649_v21 = vsel %vm1559_vm10, 1.0, %v2013_v5 }
 0x678   :  { %v1518_v59 = vsel %vm118_vm5, %v1517_v46, 0.0  ;;  %vm1564_vm5 = vcmp.eq.s32.totalorder %v2373_v44, 4 }
 0x679   :  { %1519 = vadd.xlane.f32.xlu0 %v1518_v59  ;;  %v1650_v51 = vsel %vm1564_vm5, 1.0, %v2013_v5 }
 0x706   :  { %v1520_v20 = vpop.xlane.xlu0 %1519 }
 0x707   :  { %v1529_v61 = vmul.f32 %v2010_v43, %v1520_v20 }
 0x709   :  { %v1538_v24 = vmul.f32 2.0, %v1529_v61  ;;  %v1562_v26 = vmul.f32 %v1649_v21, %v1529_v61 }
 0x70b   :  { %v1539_v0 = vadd.f32 %v1538_v24, %v1537_v6  ;;  %v1563_v28 = vadd.f32 %v1562_v26, %v2483_v4 }
 0x70d   :  { %1569 = vperm.xlu1 %1990, %v1539_v0  }
 0x78c   :  { %v1570_v56 = vpop.permute.xlu1 %1569 }
 0x78d   :  { %v1572_v18 = vmul.f32 %v1650_v51, %v1570_v56 }
 0x78f   :  { %v1573_v62 = vadd.f32 %v1572_v18, %v1563_v28 }
 0x791   :  { %1574 = vst [vmem:[%s2551_s21] sm:$0x1] %v1573_v62 }

</bundles_post_ra>
